<compile_context>
chip_gen: v5e
topology: v5e:2x2
jax: 0.10.0
libtpu: 0.0.40
codegen_flags: <defaults>
</compile_context>

<pallas_src>
import functools
import math

import numpy as np
import jax
import jax.numpy as jnp
from jax import lax
from jax.experimental import pallas as pl
from jax.experimental.pallas import tpu as pltpu


def _round_up(x, m):
    return ((x + m - 1) // m) * m


# ---------------------------------------------------------------------------
# Shared helper: first-occurrence argmax over the class (sublane) axis.
# vals: (c_pad, TM) -- classes on sublanes, frames on lanes.  Returns (1, TM) i32.
# ---------------------------------------------------------------------------
def _argmax_over_sublanes(vals, num_classes):
    cp = vals.shape[0]
    row = lax.broadcasted_iota(jnp.int32, vals.shape, 0)       # class id per sublane
    vm = jnp.where(row < num_classes, vals, -jnp.inf)          # mask padded classes
    m = jnp.max(vm, axis=0, keepdims=True)                     # (1, TM)
    idx = jnp.min(jnp.where(vm == m, row, cp), axis=0, keepdims=True)
    return idx.astype(jnp.int32)


# ---------------------------------------------------------------------------
# Kernel 1: fused two-stream linear "model" + per-frame pred argmax + gt argmax.
#   logits_t = W_t @ x_block^T + b   (classes on sublanes, frames on lanes)
# ---------------------------------------------------------------------------
def _model_argmax_kernel(x_ref, w_ref, b_ref, yt_ref,
                         logits_ref, pred_ref, gt_ref,
                         *, num_classes, num_frames, block_m):
    # (c_pad, K) x (block_m, K) contracted over K -> (c_pad, block_m): logits come
    # off the MXU already in the transposed, lane-dense layout the AP kernel wants.
    logits = lax.dot_general(
        w_ref[...], x_ref[...],
        dimension_numbers=(((1,), (1,)), ((), ())),
        preferred_element_type=jnp.float32) + b_ref[...]        # bias bcast over lanes

    # Mask padded frame columns with a large-negative f32 sentinel so this buffer
    # can feed the AP kernel directly (padded frames never outrank real frames).
    frame = (lax.broadcasted_iota(jnp.int32, logits.shape, 1)
             + pl.program_id(0) * block_m)
    logits = jnp.where(frame < num_frames, logits, -1e30)
    logits_ref[...] = logits                                     # (c_pad, TM) lane-dense

    # Per-frame argmax of pred logits and of (one-hot) gt targets, both already in
    # classes-on-sublanes layout.  The (1, TM) result is replicated to 8 sublanes
    # only to keep the int32 output block (8, 128)-tileable.
    pred_ref[...] = jnp.broadcast_to(
        _argmax_over_sublanes(logits, num_classes), pred_ref.shape)
    gt_ref[...] = jnp.broadcast_to(
        _argmax_over_sublanes(yt_ref[...], num_classes), gt_ref.shape)


def _pick_block_m(k_dim, c_pad, requested=1024, budget_bytes=24 * 1024 * 1024):
    """Largest halving of `requested` whose double-buffered per-block VMEM
    footprint (f32 features + transposed targets in, logits + pred + gt out)
    stays within budget (keeps kernel 1 safe on v7x's 64 MiB physical VMEM and
    under the explicit vmem_limit_bytes on v5e/v6e)."""
    def vmem_bytes(b):
        per_block = 4 * b * (k_dim + 2 * c_pad + 2 * 8)
        return 2 * per_block                          # double-buffered pipeline
    bm = max(128, requested)
    while bm > 128 and vmem_bytes(bm) > budget_bytes:
        bm //= 2
    return bm


def model_argmax_gt_forward(x_p, w_t, b_t, y_t, *, num_classes, num_frames, block_m):
    """x_p: (n_pad, K) f32, w_t: (c_pad, K), b_t: (c_pad, 1), y_t: (c_pad, n_pad).
    Returns logits_t (c_pad, n_pad) f32 (padded frames = -1e30), pred (n_pad,) i32,
    gt (n_pad,) i32."""
    n_pad, k = x_p.shape
    c_pad = w_t.shape[0]
    assert block_m % 128 == 0 and n_pad % block_m == 0

    logits_t, pred_p, gt_p = pl.pallas_call(
        functools.partial(_model_argmax_kernel, num_classes=num_classes,
                          num_frames=num_frames, block_m=block_m),
        out_shape=(jax.ShapeDtypeStruct((c_pad, n_pad), jnp.float32),
                   jax.ShapeDtypeStruct((8, n_pad), jnp.int32),
                   jax.ShapeDtypeStruct((8, n_pad), jnp.int32)),
        grid_spec=pltpu.PrefetchScalarGridSpec(
            num_scalar_prefetch=0,
            grid=(n_pad // block_m,),
            in_specs=[
                pl.BlockSpec((block_m, k), lambda m: (m, 0)),     # frame block of features
                pl.BlockSpec((c_pad, k), lambda m: (0, 0)),       # resident weights (transposed)
                pl.BlockSpec((c_pad, 1), lambda m: (0, 0)),       # resident bias
                pl.BlockSpec((c_pad, block_m), lambda m: (0, m)), # transposed gt targets
            ],
            out_specs=(
                pl.BlockSpec((c_pad, block_m), lambda m: (0, m)), # logits (transposed, lane-dense)
                pl.BlockSpec((8, block_m), lambda m: (0, m)),     # pred argmax
                pl.BlockSpec((8, block_m), lambda m: (0, m)),     # gt argmax
            ),
        ),
        compiler_params=pltpu.CompilerParams(
            dimension_semantics=("parallel",),
            vmem_limit_bytes=48 * 1024 * 1024),
    )(x_p, w_t, b_t, y_t)
    return logits_t, pred_p[0], gt_p[0]


# ---------------------------------------------------------------------------
# Kernel 2: tiled per-frame average precision (pairwise rank counting).
#   tp[c,i] = sum_j y[c,j] * (s[c,j] >= s[c,i])
#   pp[c,i] = sum_j         (s[c,j] >= s[c,i])
#   AP_c    = (1/P_c) * sum_{i: y_ci=1} tp[c,i] / pp[c,i]
# Grid: (anchor blocks i -> "parallel", streamed blocks j -> "arbitrary").
# Streamed frames are processed in 128-lane chunks via an unrolled fori_loop;
# tp/pp accumulate in f32 VMEM scratch with @pl.when init/finalize.
# ---------------------------------------------------------------------------
def _ap_kernel(s_a_ref, s_o_ref, y_a_ref, y_o_ref, out_ref, tp_ref, pp_ref, *, chunk):
    j = pl.program_id(1)

    @pl.when(j == 0)
    def _init():
        tp_ref[...] = jnp.zeros_like(tp_ref)
        pp_ref[...] = jnp.zeros_like(pp_ref)

    # Anchor relayout (frames: lanes -> sublanes), hoisted out of the chunk loop:
    # executed once per (i, j) grid step, O(C*TI), negligible vs the
    # O(C*TI*tile_j) compare work and cheaper than a VMEM scratch round-trip.
    s_a_b = s_a_ref[...][:, :, None]                              # (C, TI, 1)

    c, ti = s_a_ref.shape
    n_chunks = s_o_ref.shape[1] // chunk

    def body(kk, carry):
        tp, pp = carry
        off = pl.multiple_of(kk * chunk, chunk)
        s_o_c = s_o_ref[:, pl.ds(off, chunk)][:, None, :]         # (C, 1, CHUNK)
        y_o_c = y_o_ref[:, pl.ds(off, chunk)][:, None, :]         # (C, 1, CHUNK)
        ge = s_o_c >= s_a_b                                       # (C, TI, CHUNK)
        tp = tp + jnp.sum(jnp.where(ge, y_o_c, 0.0), axis=-1)     # pure f32 VPU math
        pp = pp + jnp.sum(jnp.where(ge, 1.0, 0.0), axis=-1)
        return tp, pp

    zero = jnp.zeros((c, ti), jnp.float32)
    tp, pp = lax.fori_loop(0, n_chunks, body, (zero, zero), unroll=True)
    tp_ref[...] += tp
    pp_ref[...] += pp

    @pl.when(j == pl.num_programs(1) - 1)
    def _finalize():
        # Divides only at finalize; pp >= 1 always (self-compare included).
        out_ref[...] = y_a_ref[...] * tp_ref[...] / pp_ref[...]


def perframe_average_precision(scores_t, targets_t, num_classes, tile_i=128, tile_j=1024):
    """scores_t/targets_t: (c_pad, n_pad), classes on sublanes / frames on lanes;
    padded frames have score -1e30 and zero labels."""
    c_pad, n_pad = scores_t.shape
    assert targets_t.shape == (c_pad, n_pad)
    assert tile_i % 128 == 0 and tile_j % 128 == 0
    assert n_pad % tile_i == 0 and n_pad % tile_j == 0

    grid = (n_pad // tile_i, n_pad // tile_j)
    prec_num = pl.pallas_call(
        functools.partial(_ap_kernel, chunk=128),
        out_shape=jax.ShapeDtypeStruct((c_pad, n_pad), jnp.float32),
        grid_spec=pltpu.PrefetchScalarGridSpec(
            num_scalar_prefetch=0,
            grid=grid,
            in_specs=[
                pl.BlockSpec((c_pad, tile_i), lambda i, j: (0, i)),   # anchor scores
                pl.BlockSpec((c_pad, tile_j), lambda i, j: (0, j)),   # streamed scores
                pl.BlockSpec((c_pad, tile_i), lambda i, j: (0, i)),   # anchor labels
                pl.BlockSpec((c_pad, tile_j), lambda i, j: (0, j)),   # streamed labels
            ],
            out_specs=pl.BlockSpec((c_pad, tile_i), lambda i, j: (0, i)),
            scratch_shapes=[pltpu.VMEM((c_pad, tile_i), jnp.float32),  # tp accumulator
                            pltpu.VMEM((c_pad, tile_i), jnp.float32)], # pp accumulator
        ),
        compiler_params=pltpu.CompilerParams(
            dimension_semantics=("parallel", "arbitrary"),
            vmem_limit_bytes=32 * 1024 * 1024),
    )(scores_t, scores_t, targets_t, targets_t)

    # Tiny O(N*C) epilogue in plain JAX.
    ap_num = jnp.sum(prec_num, axis=1)[:num_classes]
    pos = jnp.sum(targets_t, axis=1)[:num_classes]
    valid = pos > 0
    per_class_ap = ap_num / jnp.maximum(pos, 1.0)
    mean_ap = jnp.sum(jnp.where(valid, per_class_ap, 0.0)) / jnp.maximum(
        jnp.sum(valid.astype(jnp.float32)), 1.0)
    return {"per_class_AP": per_class_ap, "valid": valid, "mean_AP": mean_ap}


# ---------------------------------------------------------------------------
# Evaluate: JAX/Pallas port of the PyTorch module's forward (= eval loop).
# ---------------------------------------------------------------------------
class Evaluate:
    def __init__(self, cfg):
        self.cfg = cfg
        self.metric = cfg["metric"]
        self.data_processing = None  # TODO(synk): thumos_postprocessing branch not ported.
        self.all_class_names = cfg["class_names"]
        # TODO(synk): json video_list_path loading and output_miniRoad/*.json dumping
        # are host-side I/O with no kernel equivalent; handled as in-memory dicts.
        # TODO(synk): logger / wall-clock FPS reporting is omitted.

    def forward(self, model_params, dataloader, block_m=1024, ap_tiles=(128, 1024)):
        w_rgb, w_flow, b = model_params
        # Batch the per-video loop into single gridded pallas_calls.
        rgb = jnp.stack([d[0] for d in dataloader])       # (V, T, Dr)
        flow = jnp.stack([d[1] for d in dataloader])      # (V, T, Df)
        targets = jnp.stack([d[2] for d in dataloader])   # (V, T, C)
        vids = [d[3] for d in dataloader]
        v, t, dr = rgb.shape
        c = w_rgb.shape[1]
        k = dr + flow.shape[-1]
        n = v * t

        c_pad = _round_up(max(c, 1), 8)                   # classes padded to sublanes only
        tile_i, tile_j = ap_tiles
        block_m = _pick_block_m(k, c_pad, requested=block_m)
        n_pad = _round_up(max(n, 1), math.lcm(block_m, tile_i, tile_j))

        # Features stay f32 end-to-end (no separate bf16 cast/pad pass); a single
        # concat + row-pad builds the kernel input.
        feats = jnp.concatenate([rgb, flow], axis=-1).reshape(n, k).astype(jnp.float32)
        x_p = jnp.zeros((n_pad, k), jnp.float32).at[:n].set(feats)
        # Fuse the two per-stream matmuls into one; weights transposed so the kernel
        # emits logits with classes on sublanes / frames on lanes.
        w_t = jnp.zeros((c_pad, k), jnp.float32).at[:c].set(
            jnp.concatenate([w_rgb, w_flow], axis=0).astype(jnp.float32).T)
        b_t = jnp.zeros((c_pad, 1), jnp.float32).at[:c, 0].set(
            jnp.asarray(b, jnp.float32).reshape(-1))
        # Transposed one-hot targets, shared by kernel 1 (gt argmax) and the AP kernel.
        y_t = jnp.zeros((c_pad, n_pad), jnp.float32).at[:c, :n].set(
            targets.reshape(n, c).astype(jnp.float32).T)

        logits_t, pred, gt = model_argmax_gt_forward(
            x_p, w_t, b_t, y_t, num_classes=c, num_frames=n, block_m=block_m)

        output = {}
        if self.cfg["eval"] is not None:
            for vi, vid in enumerate(vids):
                sl = slice(vi * t, (vi + 1) * t)
                output[vid] = {"pred": pred[sl], "gt": gt[sl]}

        result = perframe_average_precision(logits_t, y_t, num_classes=c,
                                             tile_i=tile_i, tile_j=tile_j)
        scores = logits_t[:c, :n].T                        # (N, C) for checks / consumers
        gt_flat = targets.reshape(n, c)
        return result["mean_AP"], output, scores, gt_flat


# ---------------------------------------------------------------------------
# Reference math (numpy) for sanity checks.
# ---------------------------------------------------------------------------
def _np_average_precision(y, s):
    order = np.argsort(-s, kind="stable")
    ys = y[order]
    cum_tp = np.cumsum(ys)
    prec = cum_tp / np.arange(1, len(s) + 1)
    return float(np.sum(prec * ys) / np.sum(ys))


def _np_mean_ap(scores, targets):
    aps = []
    for ci in range(scores.shape[1]):
        if targets[:, ci].sum() > 0:
            aps.append(_np_average_precision(targets[:, ci], scores[:, ci]))
    return float(np.mean(aps))


if __name__ == "__main__":
    key = jax.random.PRNGKey(0)
    # N = 4*500 = 2000 frames -> n_pad = 2048: exercises multi-block kernel-1 grid,
    # the padded-frame masking path, and a (16, 2) AP grid at the default tiles.
    num_videos, T, Dr, Df, C = 4, 500, 32, 32, 8

    k_wr, k_wf, k_b, k_data = jax.random.split(key, 4)
    w_rgb = jax.random.normal(k_wr, (Dr, C), jnp.float32) * 0.1
    w_flow = jax.random.normal(k_wf, (Df, C), jnp.float32) * 0.1
    b = jax.random.normal(k_b, (1, C), jnp.float32) * 0.1

    # Deterministic synthetic "dataloader": (rgb, flow, one-hot target, vid).
    dataloader = []
    for vid_i in range(num_videos):
        k_data, kr, kf, kt = jax.random.split(k_data, 4)
        rgb_v = jax.random.normal(kr, (T, Dr), jnp.float32)
        flow_v = jax.random.normal(kf, (T, Df), jnp.float32)
        cls_v = jax.random.randint(kt, (T,), 0, C)
        target_v = jax.nn.one_hot(cls_v, C, dtype=jnp.float32)
        dataloader.append((rgb_v, flow_v, target_v, f"video_{vid_i}"))

    cfg = {
        "metric": "AP",
        "data_name": "SYNTH_OAD",
        "eval": "save",
        "class_names": [f"class_{i}" for i in range(C)],
    }
    evaluator = Evaluate(cfg)
    mean_ap, output, scores, targets = evaluator.forward((w_rgb, w_flow, b), dataloader)

    mean_ap = jax.block_until_ready(mean_ap)
    scores = jax.block_until_ready(scores)
    for vdict in output.values():
        jax.block_until_ready(vdict["pred"])
        jax.block_until_ready(vdict["gt"])

    scores_np = np.asarray(scores)
    targets_np = np.asarray(targets)

    # 1) fused f32 matmul vs f64 numpy (loose tolerance covers MXU default precision).
    feats_np = np.concatenate(
        [np.concatenate([np.asarray(d[0]), np.asarray(d[1])], axis=1) for d in dataloader],
        axis=0)
    w_np = np.concatenate([np.asarray(w_rgb), np.asarray(w_flow)], axis=0)
    ref_logits = feats_np @ w_np + np.asarray(b)
    assert np.allclose(scores_np, ref_logits, atol=5e-2), \
        float(np.abs(scores_np - ref_logits).max())

    # 2) argmax dumps: exact vs numpy argmax on the same (kernel) logits / targets.
    for vi, (rgb_v, flow_v, tgt_v, vid) in enumerate(dataloader):
        sl = slice(vi * T, (vi + 1) * T)
        assert np.array_equal(np.asarray(output[vid]["pred"]),
                              np.argmax(scores_np[sl], axis=1))
        assert np.array_equal(np.asarray(output[vid]["gt"]),
                              np.argmax(np.asarray(tgt_v), axis=1))

    # 3) mean AP vs stable-sort numpy reference.  Tolerance 1e-3: the pairwise
    #    '>=' rank counting differs from stable argsort only on exact f32 ties.
    ref_map = _np_mean_ap(scores_np, targets_np)
    assert abs(float(mean_ap) - ref_map) < 1e-3, (float(mean_ap), ref_map)

    print("KERNEL_OK")
</pallas_src>

<mosaic_0001>
module attributes {stable_mosaic.version = 11 : i64} {
  func.func @_model_argmax_kernel(%arg0: i32, %arg1: memref<1024x64xf32, #tpu.memory_space<vmem>>, %arg2: memref<8x64xf32, #tpu.memory_space<vmem>>, %arg3: memref<8x1xf32, #tpu.memory_space<vmem>>, %arg4: memref<8x1024xf32, #tpu.memory_space<vmem>>, %arg5: memref<8x1024xf32, #tpu.memory_space<vmem>>, %arg6: memref<8x1024xi32, #tpu.memory_space<vmem>>, %arg7: memref<8x1024xi32, #tpu.memory_space<vmem>>) attributes {dimension_semantics = [#tpu.dimension_semantics<parallel>], iteration_bounds = array<i64: 2>, scalar_prefetch = 0 : i64, scratch_operands = 0 : i64, tpu.core_type = #tpu.core_type<tc>, window_params = [{transform_indices = @transform_0, window_bounds = array<i64: 1024, 64>}, {pipeline_mode = #tpu.pipeline_mode<synchronous>, transform_indices = @transform_1, window_bounds = array<i64: 8, 64>}, {pipeline_mode = #tpu.pipeline_mode<synchronous>, transform_indices = @transform_2, window_bounds = array<i64: 8, 1>}, {transform_indices = @transform_3, window_bounds = array<i64: 8, 1024>}, {transform_indices = @transform_4, window_bounds = array<i64: 8, 1024>}, {transform_indices = @transform_5, window_bounds = array<i64: 8, 1024>}, {transform_indices = @transform_6, window_bounds = array<i64: 8, 1024>}]} {
    %c0 = arith.constant 0 : index
    %c0_0 = arith.constant 0 : index
    %0 = vector.load %arg2[%c0, %c0_0] : memref<8x64xf32, #tpu.memory_space<vmem>>, vector<8x64xf32>
    %c0_1 = arith.constant 0 : index
    %c0_2 = arith.constant 0 : index
    %1 = vector.load %arg1[%c0_1, %c0_2] : memref<1024x64xf32, #tpu.memory_space<vmem>>, vector<1024x64xf32>
    %cst = arith.constant dense<0.000000e+00> : vector<8x1024xf32>
    %2 = tpu.matmul %0, %1, %cst {dimension_numbers = #tpu.dot_dimension_numbers<[1], [1], [0], [0], [0, 0, 1, 0], [], []>} : vector<8x64xf32>, vector<1024x64xf32>, vector<8x1024xf32> -> vector<8x1024xf32>
    %c0_3 = arith.constant 0 : index
    %c0_4 = arith.constant 0 : index
    %3 = vector.load %arg3[%c0_3, %c0_4] : memref<8x1xf32, #tpu.memory_space<vmem>>, vector<8x1xf32>
    %4 = vector.broadcast %3 : vector<8x1xf32> to vector<8x1024xf32>
    %5 = arith.addf %2, %4 : vector<8x1024xf32>
    %6 = tpu.iota {dimensions = array<i32: 1>} : vector<8x1024xi32>
    %c1024_i32 = arith.constant 1024 : i32
    %7 = arith.muli %arg0, %c1024_i32 : i32
    %8 = vector.broadcast %7 : i32 to vector<8x1024xi32>
    %9 = arith.addi %6, %8 : vector<8x1024xi32>
    %c2000_i32 = arith.constant 2000 : i32
    %10 = vector.broadcast %c2000_i32 : i32 to vector<8x1024xi32>
    %11 = arith.cmpi slt, %9, %10 : vector<8x1024xi32>
    %cst_5 = arith.constant -1.000000e+30 : f32
    %12 = vector.broadcast %cst_5 : f32 to vector<8x1024xf32>
    %13 = arith.select %11, %5, %12 : vector<8x1024xi1>, vector<8x1024xf32>
    %c0_6 = arith.constant 0 : index
    %c0_7 = arith.constant 0 : index
    %14 = vector.load %arg5[%c0_6, %c0_7] : memref<8x1024xf32, #tpu.memory_space<vmem>>, vector<8x1024xf32>
    tpu.vector_store %arg5[%c0_6, %c0_7], %13 {strides = array<i32>} : memref<8x1024xf32, #tpu.memory_space<vmem>>, vector<8x1024xf32>,
    %15 = tpu.iota {dimensions = array<i32: 0>} : vector<8x1024xi32>
    %c8_i32 = arith.constant 8 : i32
    %16 = vector.broadcast %c8_i32 : i32 to vector<8x1024xi32>
    %17 = arith.cmpi slt, %15, %16 : vector<8x1024xi32>
    %cst_8 = arith.constant 0xFF800000 : f32
    %18 = vector.broadcast %cst_8 : f32 to vector<8x1024xf32>
    %19 = arith.select %17, %13, %18 : vector<8x1024xi1>, vector<8x1024xf32>
    %cst_9 = arith.constant dense<0xFF800000> : vector<1024xf32>
    %20 = vector.multi_reduction <maximumf>, %19, %cst_9 [0] : vector<8x1024xf32> to vector<1024xf32>
    %21 = vector.shape_cast %20 : vector<1024xf32> to vector<1x1024xf32>
    %22 = vector.broadcast %21 : vector<1x1024xf32> to vector<8x1024xf32>
    %23 = arith.cmpf oeq, %19, %22 : vector<8x1024xf32>
    %c8_i32_10 = arith.constant 8 : i32
    %24 = vector.broadcast %c8_i32_10 : i32 to vector<8x1024xi32>
    %25 = arith.select %23, %15, %24 : vector<8x1024xi1>, vector<8x1024xi32>
    %cst_11 = arith.constant dense<2147483647> : vector<1024xi32>
    %26 = vector.multi_reduction <minsi>, %25, %cst_11 [0] : vector<8x1024xi32> to vector<1024xi32>
    %27 = vector.shape_cast %26 : vector<1024xi32> to vector<1x1024xi32>
    %28 = vector.shape_cast %27 : vector<1x1024xi32> to vector<1x1024xi32>
    %29 = vector.broadcast %28 : vector<1x1024xi32> to vector<8x1024xi32>
    %c0_12 = arith.constant 0 : index
    %c0_13 = arith.constant 0 : index
    %30 = vector.load %arg6[%c0_12, %c0_13] : memref<8x1024xi32, #tpu.memory_space<vmem>>, vector<8x1024xi32>
    tpu.vector_store %arg6[%c0_12, %c0_13], %29 {strides = array<i32>} : memref<8x1024xi32, #tpu.memory_space<vmem>>, vector<8x1024xi32>,
    %c0_14 = arith.constant 0 : index
    %c0_15 = arith.constant 0 : index
    %31 = vector.load %arg4[%c0_14, %c0_15] : memref<8x1024xf32, #tpu.memory_space<vmem>>, vector<8x1024xf32>
    %32 = tpu.iota {dimensions = array<i32: 0>} : vector<8x1024xi32>
    %c8_i32_16 = arith.constant 8 : i32
    %33 = vector.broadcast %c8_i32_16 : i32 to vector<8x1024xi32>
    %34 = arith.cmpi slt, %32, %33 : vector<8x1024xi32>
    %cst_17 = arith.constant 0xFF800000 : f32
    %35 = vector.broadcast %cst_17 : f32 to vector<8x1024xf32>
    %36 = arith.select %34, %31, %35 : vector<8x1024xi1>, vector<8x1024xf32>
    %cst_18 = arith.constant dense<0xFF800000> : vector<1024xf32>
    %37 = vector.multi_reduction <maximumf>, %36, %cst_18 [0] : vector<8x1024xf32> to vector<1024xf32>
    %38 = vector.shape_cast %37 : vector<1024xf32> to vector<1x1024xf32>
    %39 = vector.broadcast %38 : vector<1x1024xf32> to vector<8x1024xf32>
    %40 = arith.cmpf oeq, %36, %39 : vector<8x1024xf32>
    %c8_i32_19 = arith.constant 8 : i32
    %41 = vector.broadcast %c8_i32_19 : i32 to vector<8x1024xi32>
    %42 = arith.select %40, %32, %41 : vector<8x1024xi1>, vector<8x1024xi32>
    %cst_20 = arith.constant dense<2147483647> : vector<1024xi32>
    %43 = vector.multi_reduction <minsi>, %42, %cst_20 [0] : vector<8x1024xi32> to vector<1024xi32>
    %44 = vector.shape_cast %43 : vector<1024xi32> to vector<1x1024xi32>
    %45 = vector.shape_cast %44 : vector<1x1024xi32> to vector<1x1024xi32>
    %46 = vector.broadcast %45 : vector<1x1024xi32> to vector<8x1024xi32>
    %c0_21 = arith.constant 0 : index
    %c0_22 = arith.constant 0 : index
    %47 = vector.load %arg7[%c0_21, %c0_22] : memref<8x1024xi32, #tpu.memory_space<vmem>>, vector<8x1024xi32>
    tpu.vector_store %arg7[%c0_21, %c0_22], %46 {strides = array<i32>} : memref<8x1024xi32, #tpu.memory_space<vmem>>, vector<8x1024xi32>,
    return
  }
  func.func @transform_0(%arg0: i32) -> (i32, i32) {
    %c0_i32 = arith.constant 0 : i32
    %c0_i32_0 = arith.constant 0 : i32
    return %arg0, %c0_i32 : i32, i32
  }
  func.func @transform_1(%arg0: i32) -> (i32, i32) {
    %c0_i32 = arith.constant 0 : i32
    %c0_i32_0 = arith.constant 0 : i32
    %c0_i32_1 = arith.constant 0 : i32
    return %c0_i32, %c0_i32_0 : i32, i32
  }
  func.func @transform_2(%arg0: i32) -> (i32, i32) {
    %c0_i32 = arith.constant 0 : i32
    %c0_i32_0 = arith.constant 0 : i32
    %c0_i32_1 = arith.constant 0 : i32
    return %c0_i32, %c0_i32_0 : i32, i32
  }
  func.func @transform_3(%arg0: i32) -> (i32, i32) {
    %c0_i32 = arith.constant 0 : i32
    %c0_i32_0 = arith.constant 0 : i32
    return %c0_i32, %arg0 : i32, i32
  }
  func.func @transform_4(%arg0: i32) -> (i32, i32) {
    %c0_i32 = arith.constant 0 : i32
    %c0_i32_0 = arith.constant 0 : i32
    return %c0_i32, %arg0 : i32, i32
  }
  func.func @transform_5(%arg0: i32) -> (i32, i32) {
    %c0_i32 = arith.constant 0 : i32
    %c0_i32_0 = arith.constant 0 : i32
    return %c0_i32, %arg0 : i32, i32
  }
  func.func @transform_6(%arg0: i32) -> (i32, i32) {
    %c0_i32 = arith.constant 0 : i32
    %c0_i32_0 = arith.constant 0 : i32
    return %c0_i32, %arg0 : i32, i32
  }
}

</mosaic_0001>

<bundles_post_ra>
// kernel: tpu_custom_call.1
= control target key start
LH: loop header
LB: loop body
LE: loop exit
PB: predicated region body
PF: predicated region fallthrough
CT: control target
= control target key end

     0   :  { %12 = vsyncpa [#allocation3], 0  ;;  %s2556_s0 = inlined_call_operand.vmem [shape: f32[2048,64], index: 0, kind: input, shape index: {}]   ;;  %s2557_s1 = inlined_call_operand.vmem [shape: f32[8,64], index: 1, kind: input, shape index: {}]   ;;  %s2558_s2 = inlined_call_operand.vmem [shape: f32[8,1], index: 2, kind: input, shape index: {}]   ;;  %s2559_s3 = inlined_call_operand.vmem [shape: f32[8,2048], index: 3, kind: input, shape index: {}]   ;;  %s2560_s4 = inlined_call_operand.hbm [shape: f32[8,2048], index: 4, kind: output, shape index: {0}]   ;;  %s2561_s5 = inlined_call_operand.hbm [shape: s32[8,2048], index: 5, kind: output, shape index: {1}]   ;;  %s2562_s6 = inlined_call_operand.hbm [shape: s32[8,2048], index: 6, kind: output, shape index: {2}]  }
   0x1   :  { %14 = vsyncpa [#allocation3 + $0x1], 0 }
   0x2   :  { %15 = vsyncpa [#allocation5], 0 }
   0x3   :  { %17 = vsyncpa [#allocation5 + $0x1], 0  ;;  %s1900_s21 = smov 0   ;;  %s1902_s22 = smov 0  }
   0x4   :  { %s1904_s23 = smov 0   ;;  %s1906_s24 = smov 0  }
   0x5 LB: > { %s1921_s25 = sadd.s32 4294967295, %s1862_s24   ;;  %s1527_s26 = sadd.s32 4294967294, %s1862_s24   ;;  %s1862_s24 = sphi %s1906_s24, %s2576_s24   ;;  %s1858_s23 = sphi %s1904_s23, %s2575_s23   ;;  %s1854_s22 = sphi %s1902_s22, %s2574_s22   ;;  %s1850_s21 = sphi %s1900_s21, %s2573_s21  }
   0x6   : > { %s1925_s27 = sadd.s32 1, %s1862_s24   ;;  %s124_s28 = sadd.s32 1, %s1858_s23 }
   0x7   : > { %s121_s29 = ssub.s32 %s1862_s24, %s1925_s27  ;;  %p134_p0 = scmp.ne.s32.totalorder %s1858_s23, %s1854_s22 }
   0x8   : > { %p122_p1 = scmp.eq.s32.totalorder %s121_s29, 0  ;;  %p135_p2 = scmp.eq.s32.totalorder %s1921_s25, 1 }
   0x9   : > { %p140_p3 = scmp.ne.s32.totalorder %s1854_s22, %s1850_s21  ;;  %p141_p4 = scmp.eq.s32.totalorder %s1527_s26, 1 }
   0xa   : > { %s1938_s30 = scalar_select %p122_p1, %s1858_s23, %s124_s28  }
   0xb   : > { %p1940_p5 = por %p135_p2, %p134_p0  ;;  %p1944_p6 = por %p141_p4, %p140_p3 }
   0xc   : > { %p1530_p7 = scmp.ge.s32.totalorder %s1862_s24, 1  ;;  %p235_p8 = scmp.lt.s32.totalorder %s1862_s24, 3 }
   0xe   : > { %p236_p9 = pnand %p1530_p7, %p235_p8 }
   0xf   : > { %s1534_s9 = sshll.u32 (!%p236_p9), %s1921_s25, 7  ;;  %s1674_s18 = sshll.u32 (!%p236_p9), %s1921_s25, 10 }
  0x10   : > { %239 = sbr.rel (%p236_p9) target bundleno = 334 (0x14e), region = 36  ;;  %p281_p10 = scmp.lt.s32.totalorder (!%p236_p9), %s1534_s9, 255 }
  0x11   : > { %s263_s19 = sand.u32 (!%p236_p9), 1, %s1854_s22   ;;  %s1536_s29 = sshll.u32 (!%p236_p9), %s1921_s25, 3 }
  0x12   : > { %s2246_s20 = sshll.u32 (!%p236_p9), %s263_s19, 6  ;;  %p287_p11 = scmp.lt.s32.totalorder (!%p236_p9), %s1536_s29, 15 }
  0x13   : > { %s2261_s28 = scalar_lea.vmem (!%p236_p9), [#allocation2], %s2246_s20  ;;  %s2361_s14 = sshll.u32 (!%p236_p9), %s1921_s25, 6 }
  0x14   : > { %s1358_s17 = scalar_lea.hbm (!%p236_p9), %s2560_s4, %s2361_s14  ;;  %s1760_s15 = scalar_lea.hbm (!%p236_p9), %s2560_s4, 128 }
  0x15   : > { %s2578_s9 = smov (!%p281_p10, %s1534_s9), 255  ;;  %vm430_vm0 = vcmask 523264   ;;  %s2580_s29 = smov (!%p287_p11, %s1536_s29), 15 }
  0x16   : > { %s1535_s10 = sshll.u32 %s2578_s9, 3  ;;  %s1537_s9 = sshll.u32 %s2580_s29, 3 }
  0x17   : > { %s1954_s13 = scalar_lea.vmem %s2556_s0, %s1535_s10  ;;  %s2275_s10 = scalar_lea.vmem [#allocation4], %s2246_s20 }
  0x18   : > { %v311_v0 = vld [vmem:[%s1954_s13 + $0x78] sm:$0xff]  ;;  %v310_v4 = vld [vmem:[%s1954_s13 + $0x70] sm:$0xff]  ;;  %v309_v8 = vld [vmem:[%s1954_s13 + $0x68] sm:$0xff]  ;;  %s2400_s29 = sshll.u32 %s1358_s17, 4  ;;  %s1363_s29 = int_to_ptr.hbm [resolvable:$true] %s2400_s29 }
  0x19   : > { %v327_v1 = vld [vmem:[%s1954_s13 + $0xf8] sm:$0xff]  ;;  %1538 = vmatpush.xpose.msk.msra.mxu0 %vm430_vm0, %v311_v0  ;;  %v326_v5 = vld [vmem:[%s1954_s13 + $0xf0] sm:$0xff]  ;;  %v325_v9 = vld [vmem:[%s1954_s13 + $0xe8] sm:$0xff]  ;;  %s1754_s11 = sshra.s32 %s1363_s29, 4  ;;  %s1755_s11 = int_to_ptr.hbm [resolvable:$true] %s1754_s11 }
  0x1a   : > { %v343_v2 = vld [vmem:[%s1954_s13 + $0x178] sm:$0xff]  ;;  %1555 = vmatpush.xpose.msk.msra.mxu1 %vm430_vm0, %v327_v1  ;;  %v342_v6 = vld [vmem:[%s1954_s13 + $0x170] sm:$0xff]  ;;  %v341_v10 = vld [vmem:[%s1954_s13 + $0x168] sm:$0xff]  ;;  %s1756_s12 = scalar_lea.hbm %s1755_s11, 64  ;;  %p1761_p1 = scmp.lt.s32.totalorder %s1755_s11, %s2560_s4 }
  0x1b   : > { %v359_v3 = vld [vmem:[%s1954_s13 + $0x1f8] sm:$0xff]  ;;  %1572 = vmatpush.xpose.msk.msra.mxu2 %vm430_vm0, %v343_v2  ;;  %v358_v7 = vld [vmem:[%s1954_s13 + $0x1f0] sm:$0xff]  ;;  %v357_v11 = vld [vmem:[%s1954_s13 + $0x1e8] sm:$0xff]  ;;  %p1757_p12 = scmp.ne.s32.totalorder %s1755_s11, %s1756_s12  ;;  %p1762_p2 = scmp.lt.s32.totalorder %s1760_s15, %s1756_s12 }
  0x1c   : > { %1589 = vmatpush.xpose.msk.msra.mxu3 %vm430_vm0, %v359_v3  ;;  %v308_v12 = vld [vmem:[%s1954_s13 + $0x60] sm:$0xff]  ;;  %v307_v16 = vld [vmem:[%s1954_s13 + $0x58] sm:$0xff]  ;;  %v306_v20 = vld [vmem:[%s1954_s13 + $0x50] sm:$0xff] }
  0x1d   : > { %1539 = vmatpush.xpose.msk.msra.mxu0 %vm430_vm0, %v310_v4  ;;  %v324_v13 = vld [vmem:[%s1954_s13 + $0xe0] sm:$0xff]  ;;  %v323_v17 = vld [vmem:[%s1954_s13 + $0xd8] sm:$0xff]  ;;  %v322_v21 = vld [vmem:[%s1954_s13 + $0xd0] sm:$0xff]  ;;  %p1758_p13 = pnand %p1757_p12, %p1940_p5  ;;  %p1763_p3 = por %p1762_p2, %p1761_p1 }
  0x1e   : > { %1556 = vmatpush.xpose.msk.msra.mxu1 %vm430_vm0, %v326_v5  ;;  %v340_v14 = vld [vmem:[%s1954_s13 + $0x160] sm:$0xff]  ;;  %v339_v18 = vld [vmem:[%s1954_s13 + $0x158] sm:$0xff]  ;;  %v338_v22 = vld [vmem:[%s1954_s13 + $0x150] sm:$0xff] }
  0x1f   : > { %1573 = vmatpush.xpose.msk.msra.mxu2 %vm430_vm0, %v342_v6  ;;  %v356_v15 = vld [vmem:[%s1954_s13 + $0x1e0] sm:$0xff]  ;;  %v355_v19 = vld [vmem:[%s1954_s13 + $0x1d8] sm:$0xff]  ;;  %v354_v23 = vld [vmem:[%s1954_s13 + $0x1d0] sm:$0xff]  ;;  %p1759_p0 = pneg %p1758_p13 }
  0x20   : > { %1590 = vmatpush.xpose.msk.msra.mxu3 %vm430_vm0, %v358_v7  ;;  %v305_v24 = vld [vmem:[%s1954_s13 + $0x48] sm:$0xff]  ;;  %v304_v28 = vld [vmem:[%s1954_s13 + $0x40] sm:$0xff]  ;;  %v303_v32 = vld [vmem:[%s1954_s13 + $0x38] sm:$0xff] }
  0x21   : > { %1540 = vmatpush.xpose.msk.msra.mxu0 %vm430_vm0, %v309_v8  ;;  %v321_v25 = vld [vmem:[%s1954_s13 + $0xc8] sm:$0xff]  ;;  %v320_v29 = vld [vmem:[%s1954_s13 + $0xc0] sm:$0xff]  ;;  %v319_v33 = vld [vmem:[%s1954_s13 + $0xb8] sm:$0xff]  ;;  %p1764_p4 = pnand %p1763_p3, %p1759_p0 }
  0x22   : > { %1557 = vmatpush.xpose.msk.msra.mxu1 %vm430_vm0, %v325_v9  ;;  %v337_v26 = vld [vmem:[%s1954_s13 + $0x148] sm:$0xff]  ;;  %v336_v30 = vld [vmem:[%s1954_s13 + $0x140] sm:$0xff]  ;;  %v335_v34 = vld [vmem:[%s1954_s13 + $0x138] sm:$0xff] }
  0x23   : > { %1574 = vmatpush.xpose.msk.msra.mxu2 %vm430_vm0, %v341_v10  ;;  %v353_v27 = vld [vmem:[%s1954_s13 + $0x1c8] sm:$0xff]  ;;  %v352_v31 = vld [vmem:[%s1954_s13 + $0x1c0] sm:$0xff]  ;;  %v351_v35 = vld [vmem:[%s1954_s13 + $0x1b8] sm:$0xff] }
  0x24   : > { %1591 = vmatpush.xpose.msk.msra.mxu3 %vm430_vm0, %v357_v11  ;;  %v302_v36 = vld [vmem:[%s1954_s13 + $0x30] sm:$0xff]  ;;  %v301_v40 = vld [vmem:[%s1954_s13 + $0x28] sm:$0xff]  ;;  %v300_v44 = vld [vmem:[%s1954_s13 + $0x20] sm:$0xff] }
  0x25   : > { %1541 = vmatpush.xpose.msk.msra.mxu0 %vm430_vm0, %v308_v12  ;;  %v318_v37 = vld [vmem:[%s1954_s13 + $0xb0] sm:$0xff]  ;;  %v317_v41 = vld [vmem:[%s1954_s13 + $0xa8] sm:$0xff]  ;;  %v316_v45 = vld [vmem:[%s1954_s13 + $0xa0] sm:$0xff] }
  0x26   : > { %1558 = vmatpush.xpose.msk.msra.mxu1 %vm430_vm0, %v324_v13  ;;  %v334_v38 = vld [vmem:[%s1954_s13 + $0x130] sm:$0xff]  ;;  %v333_v42 = vld [vmem:[%s1954_s13 + $0x128] sm:$0xff]  ;;  %v332_v46 = vld [vmem:[%s1954_s13 + $0x120] sm:$0xff] }
  0x27   : > { %1575 = vmatpush.xpose.msk.msra.mxu2 %vm430_vm0, %v340_v14  ;;  %v350_v39 = vld [vmem:[%s1954_s13 + $0x1b0] sm:$0xff]  ;;  %v349_v43 = vld [vmem:[%s1954_s13 + $0x1a8] sm:$0xff]  ;;  %v348_v47 = vld [vmem:[%s1954_s13 + $0x1a0] sm:$0xff] }
  0x28   : > { %1592 = vmatpush.xpose.msk.msra.mxu3 %vm430_vm0, %v356_v15  ;;  %v299_v48 = vld [vmem:[%s1954_s13 + $0x18] sm:$0xff]  ;;  %v298_v52 = vld [vmem:[%s1954_s13 + $0x10] sm:$0xff]  ;;  %v297_v56 = vld [vmem:[%s1954_s13 + $0x8] sm:$0xff] }
  0x29   : > { %1542 = vmatpush.xpose.msk.msra.mxu0 %vm430_vm0, %v307_v16  ;;  %v315_v49 = vld [vmem:[%s1954_s13 + $0x98] sm:$0xff]  ;;  %v314_v53 = vld [vmem:[%s1954_s13 + $0x90] sm:$0xff]  ;;  %v313_v57 = vld [vmem:[%s1954_s13 + $0x88] sm:$0xff] }
  0x2a   : > { %1559 = vmatpush.xpose.msk.msra.mxu1 %vm430_vm0, %v323_v17  ;;  %v331_v50 = vld [vmem:[%s1954_s13 + $0x118] sm:$0xff]  ;;  %v330_v54 = vld [vmem:[%s1954_s13 + $0x110] sm:$0xff]  ;;  %v329_v58 = vld [vmem:[%s1954_s13 + $0x108] sm:$0xff] }
  0x2b   : > { %1576 = vmatpush.xpose.msk.msra.mxu2 %vm430_vm0, %v339_v18  ;;  %v347_v51 = vld [vmem:[%s1954_s13 + $0x198] sm:$0xff]  ;;  %v346_v55 = vld [vmem:[%s1954_s13 + $0x190] sm:$0xff]  ;;  %v345_v59 = vld [vmem:[%s1954_s13 + $0x188] sm:$0xff] }
  0x2c   : > { %1593 = vmatpush.xpose.msk.msra.mxu3 %vm430_vm0, %v355_v19  ;;  %v296_v60 = vld [vmem:[%s1954_s13] sm:$0xff]  ;;  %v375_v0 = vld [vmem:[%s1954_s13 + $0x278] sm:$0xff]  ;;  %v374_v4 = vld [vmem:[%s1954_s13 + $0x270] sm:$0xff] }
  0x2d   : > { %1543 = vmatpush.xpose.msk.msra.mxu0 %vm430_vm0, %v306_v20  ;;  %v312_v61 = vld [vmem:[%s1954_s13 + $0x80] sm:$0xff]  ;;  %v391_v1 = vld [vmem:[%s1954_s13 + $0x2f8] sm:$0xff]  ;;  %v390_v5 = vld [vmem:[%s1954_s13 + $0x2f0] sm:$0xff] }
  0x2e   : > { %1560 = vmatpush.xpose.msk.msra.mxu1 %vm430_vm0, %v322_v21  ;;  %v328_v62 = vld [vmem:[%s1954_s13 + $0x100] sm:$0xff]  ;;  %v407_v2 = vld [vmem:[%s1954_s13 + $0x378] sm:$0xff]  ;;  %v406_v7 = vld [vmem:[%s1954_s13 + $0x370] sm:$0xff] }
  0x2f   : > { %1577 = vmatpush.xpose.msk.msra.mxu2 %vm430_vm0, %v338_v22  ;;  %v344_v63 = vld [vmem:[%s1954_s13 + $0x180] sm:$0xff]  ;;  %v423_v3 = vld [vmem:[%s1954_s13 + $0x3f8] sm:$0xff]  ;;  %v422_v8 = vld [vmem:[%s1954_s13 + $0x3f0] sm:$0xff] }
  0x30   : > { %1594 = vmatpush.xpose.msk.msra.mxu3 %vm430_vm0, %v354_v23  ;;  %v2097_v6 = vld [vmem:[%s2557_s1] sm:$0xff]  ;;  %v373_v9 = vld [vmem:[%s1954_s13 + $0x268] sm:$0xff]  ;;  %v371_v17 = vld [vmem:[%s1954_s13 + $0x258] sm:$0xff] }
  0x31   : > { %1544 = vmatpush.xpose.msk.msra.mxu0 %vm430_vm0, %v305_v24  ;;  %v389_v10 = vld [vmem:[%s1954_s13 + $0x2e8] sm:$0xff]  ;;  %v372_v13 = vld [vmem:[%s1954_s13 + $0x260] sm:$0xff]  ;;  %v387_v18 = vld [vmem:[%s1954_s13 + $0x2d8] sm:$0xff] }
  0x32   : > { %1561 = vmatpush.xpose.msk.msra.mxu1 %vm430_vm0, %v321_v25  ;;  %v405_v11 = vld [vmem:[%s1954_s13 + $0x368] sm:$0xff]  ;;  %v388_v14 = vld [vmem:[%s1954_s13 + $0x2e0] sm:$0xff]  ;;  %v403_v19 = vld [vmem:[%s1954_s13 + $0x358] sm:$0xff] }
  0x33   : > { %1578 = vmatpush.xpose.msk.msra.mxu2 %vm430_vm0, %v337_v26  ;;  %v421_v12 = vld [vmem:[%s1954_s13 + $0x3e8] sm:$0xff]  ;;  %v404_v15 = vld [vmem:[%s1954_s13 + $0x360] sm:$0xff]  ;;  %v419_v20 = vld [vmem:[%s1954_s13 + $0x3d8] sm:$0xff]  ;;  %v1864_v26 = vmov 0  }
  0x34   : > { %1595 = vmatpush.xpose.msk.msra.mxu3 %vm430_vm0, %v353_v27  ;;  %v420_v16 = vld [vmem:[%s1954_s13 + $0x3e0] sm:$0xff]  ;;  %v370_v21 = vld [vmem:[%s1954_s13 + $0x250] sm:$0xff]  ;;  %1739 = vset.pattern.permute.xlu0 %v1864_v26  ;;  %v369_v27 = vld [vmem:[%s1954_s13 + $0x248] sm:$0xff] }
  0x35   : > { %1545 = vmatpush.xpose.msk.msra.mxu0 %vm430_vm0, %v304_v28  ;;  %v386_v22 = vld [vmem:[%s1954_s13 + $0x2d0] sm:$0xff]  ;;  %v424_v23 = vld [vmem:[%s2558_s2] sm:$0xff]  ;;  %v385_v28 = vld [vmem:[%s1954_s13 + $0x2c8] sm:$0xff] }
  0x36   : > { %1562 = vmatpush.xpose.msk.msra.mxu1 %vm430_vm0, %v320_v29  ;;  %v402_v24 = vld [vmem:[%s1954_s13 + $0x350] sm:$0xff]  ;;  %427 = vperm.xlu0 %1739, %v424_v23   ;;  %v401_v29 = vld [vmem:[%s1954_s13 + $0x348] sm:$0xff] }
  0x37   : > { %1579 = vmatpush.xpose.msk.msra.mxu2 %vm430_vm0, %v336_v30  ;;  %v418_v25 = vld [vmem:[%s1954_s13 + $0x3d0] sm:$0xff]  ;;  %v417_v30 = vld [vmem:[%s1954_s13 + $0x3c8] sm:$0xff] }
  0x38   : > { %1596 = vmatpush.xpose.msk.msra.mxu3 %vm430_vm0, %v352_v31  ;;  %v368_v31 = vld [vmem:[%s1954_s13 + $0x240] sm:$0xff] }
  0x39   : > { %1546 = vmatpush.xpose.msk.msra.mxu0 %vm430_vm0, %v303_v32  ;;  %v384_v32 = vld [vmem:[%s1954_s13 + $0x2c0] sm:$0xff] }
  0x3a   : > { %1563 = vmatpush.xpose.msk.msra.mxu1 %vm430_vm0, %v319_v33  ;;  %v400_v33 = vld [vmem:[%s1954_s13 + $0x340] sm:$0xff] }
  0x3b   : > { %1580 = vmatpush.xpose.msk.msra.mxu2 %vm430_vm0, %v335_v34  ;;  %v416_v34 = vld [vmem:[%s1954_s13 + $0x3c0] sm:$0xff] }
  0x3c   : > { %1597 = vmatpush.xpose.msk.msra.mxu3 %vm430_vm0, %v351_v35  ;;  %v367_v35 = vld [vmem:[%s1954_s13 + $0x238] sm:$0xff] }
  0x3d   : > { %1547 = vmatpush.xpose.msk.msra.mxu0 %vm430_vm0, %v302_v36  ;;  %v383_v36 = vld [vmem:[%s1954_s13 + $0x2b8] sm:$0xff] }
  0x3e   : > { %1564 = vmatpush.xpose.msk.msra.mxu1 %vm430_vm0, %v318_v37  ;;  %v399_v37 = vld [vmem:[%s1954_s13 + $0x338] sm:$0xff] }
  0x3f   : > { %1581 = vmatpush.xpose.msk.msra.mxu2 %vm430_vm0, %v334_v38  ;;  %v415_v38 = vld [vmem:[%s1954_s13 + $0x3b8] sm:$0xff] }
  0x40   : > { %1598 = vmatpush.xpose.msk.msra.mxu3 %vm430_vm0, %v350_v39  ;;  %v366_v39 = vld [vmem:[%s1954_s13 + $0x230] sm:$0xff] }
  0x41   : > { %1548 = vmatpush.xpose.msk.msra.mxu0 %vm430_vm0, %v301_v40  ;;  %v382_v40 = vld [vmem:[%s1954_s13 + $0x2b0] sm:$0xff] }
  0x42   : > { %1565 = vmatpush.xpose.msk.msra.mxu1 %vm430_vm0, %v317_v41  ;;  %v398_v41 = vld [vmem:[%s1954_s13 + $0x330] sm:$0xff] }
  0x43   : > { %1582 = vmatpush.xpose.msk.msra.mxu2 %vm430_vm0, %v333_v42  ;;  %v414_v42 = vld [vmem:[%s1954_s13 + $0x3b0] sm:$0xff] }
  0x44   : > { %1599 = vmatpush.xpose.msk.msra.mxu3 %vm430_vm0, %v349_v43  ;;  %v365_v43 = vld [vmem:[%s1954_s13 + $0x228] sm:$0xff] }
  0x45   : > { %1549 = vmatpush.xpose.msk.msra.mxu0 %vm430_vm0, %v300_v44  ;;  %v381_v44 = vld [vmem:[%s1954_s13 + $0x2a8] sm:$0xff] }
  0x46   : > { %1566 = vmatpush.xpose.msk.msra.mxu1 %vm430_vm0, %v316_v45  ;;  %v397_v45 = vld [vmem:[%s1954_s13 + $0x328] sm:$0xff] }
  0x47   : > { %1583 = vmatpush.xpose.msk.msra.mxu2 %vm430_vm0, %v332_v46  ;;  %v413_v46 = vld [vmem:[%s1954_s13 + $0x3a8] sm:$0xff] }
  0x48   : > { %1600 = vmatpush.xpose.msk.msra.mxu3 %vm430_vm0, %v348_v47  ;;  %v364_v47 = vld [vmem:[%s1954_s13 + $0x220] sm:$0xff] }
  0x49   : > { %1550 = vmatpush.xpose.msk.msra.mxu0 %vm430_vm0, %v299_v48  ;;  %v380_v48 = vld [vmem:[%s1954_s13 + $0x2a0] sm:$0xff] }
  0x4a   : > { %1567 = vmatpush.xpose.msk.msra.mxu1 %vm430_vm0, %v315_v49  ;;  %v396_v49 = vld [vmem:[%s1954_s13 + $0x320] sm:$0xff] }
  0x4b   : > { %1584 = vmatpush.xpose.msk.msra.mxu2 %vm430_vm0, %v331_v50  ;;  %v412_v50 = vld [vmem:[%s1954_s13 + $0x3a0] sm:$0xff] }
  0x4c   : > { %1601 = vmatpush.xpose.msk.msra.mxu3 %vm430_vm0, %v347_v51  ;;  %v363_v51 = vld [vmem:[%s1954_s13 + $0x218] sm:$0xff] }
  0x4d   : > { %1551 = vmatpush.xpose.msk.msra.mxu0 %vm430_vm0, %v298_v52  ;;  %v379_v52 = vld [vmem:[%s1954_s13 + $0x298] sm:$0xff] }
  0x4e   : > { %1568 = vmatpush.xpose.msk.msra.mxu1 %vm430_vm0, %v314_v53  ;;  %v395_v53 = vld [vmem:[%s1954_s13 + $0x318] sm:$0xff] }
  0x4f   : > { %1585 = vmatpush.xpose.msk.msra.mxu2 %vm430_vm0, %v330_v54  ;;  %v411_v54 = vld [vmem:[%s1954_s13 + $0x398] sm:$0xff] }
  0x50   : > { %1602 = vmatpush.xpose.msk.msra.mxu3 %vm430_vm0, %v346_v55  ;;  %v362_v55 = vld [vmem:[%s1954_s13 + $0x210] sm:$0xff] }
  0x51   : > { %1552 = vmatpush.xpose.msk.msra.mxu0 %vm430_vm0, %v297_v56  ;;  %v378_v56 = vld [vmem:[%s1954_s13 + $0x290] sm:$0xff] }
  0x52   : > { %1569 = vmatpush.xpose.msk.msra.mxu1 %vm430_vm0, %v313_v57  ;;  %v394_v57 = vld [vmem:[%s1954_s13 + $0x310] sm:$0xff] }
  0x53   : > { %1586 = vmatpush.xpose.msk.msra.mxu2 %vm430_vm0, %v329_v58  ;;  %v410_v58 = vld [vmem:[%s1954_s13 + $0x390] sm:$0xff] }
  0x54   : > { %1603 = vmatpush.xpose.msk.msra.mxu3 %vm430_vm0, %v345_v59  ;;  %v361_v59 = vld [vmem:[%s1954_s13 + $0x208] sm:$0xff] }
  0x55   : > { %1553 = vmatpush.xpose.msk.msra.mxu0 %vm430_vm0, %v296_v60  ;;  %v377_v60 = vld [vmem:[%s1954_s13 + $0x288] sm:$0xff] }
  0x56   : > { %1570 = vmatpush.xpose.msk.msra.mxu1 %vm430_vm0, %v312_v61  ;;  %v393_v61 = vld [vmem:[%s1954_s13 + $0x308] sm:$0xff] }
  0x57   : > { %1587 = vmatpush.xpose.msk.msra.mxu2 %vm430_vm0, %v328_v62  ;;  %v409_v62 = vld [vmem:[%s1954_s13 + $0x388] sm:$0xff] }
  0x58   : > { %1604 = vmatpush.xpose.msk.msra.mxu3 %vm430_vm0, %v344_v63  ;;  %1554 = vmatmul.msk.f32.vlgmr.msra.gmra.mxu0 %vm430_vm0, %v2097_v6  ;;  %v360_v63 = vld [vmem:[%s1954_s13 + $0x200] sm:$0xff] }
  0x59   : > { %1606 = vmatpush.xpose.msk.msrb.mxu0 %vm430_vm0, %v375_v0  ;;  %1571 = vmatmul.msk.f32.vlgmr.msra.gmra.mxu1 %vm430_vm0, %v2097_v6  ;;  %v376_v0 = vld [vmem:[%s1954_s13 + $0x280] sm:$0xff] }
  0x5a   : > { %1623 = vmatpush.xpose.msk.msrb.mxu1 %vm430_vm0, %v391_v1  ;;  %1588 = vmatmul.msk.f32.vlgmr.msra.gmra.mxu2 %vm430_vm0, %v2097_v6  ;;  %v392_v1 = vld [vmem:[%s1954_s13 + $0x300] sm:$0xff] }
  0x5b   : > { %1640 = vmatpush.xpose.msk.msrb.mxu2 %vm430_vm0, %v407_v2  ;;  %1605 = vmatmul.msk.f32.vlgmr.msra.gmra.mxu3 %vm430_vm0, %v2097_v6  ;;  %v408_v2 = vld [vmem:[%s1954_s13 + $0x380] sm:$0xff]  ;;  %s290_s13 = scalar_lea.vmem %s2559_s3, %s1537_s9  ;;  %s2416_s9 = scalar_lea.vmem [#allocation6], %s2246_s20 }
  0x5c   : > { %1657 = vmatpush.xpose.msk.msrb.mxu3 %vm430_vm0, %v423_v3  ;;  %v978_v3 = vlaneseq  ;;  %s1337_s20 = scalar_lea.sflag [#allocation3], %s263_s19 }
  0x5d   : > { %1607 = vmatpush.xpose.msk.msrb.mxu0 %vm430_vm0, %v374_v4  ;;  %v2237_v4 = vstv %s1674_s18  ;;  %s1360_s18 = sshll.u32 %s2261_s28, 4  ;;  %s2412_s18 = int_to_ptr.vmem [resolvable:$true] %s1360_s18 }
  0x5e   : > { %1624 = vmatpush.xpose.msk.msrb.mxu1 %vm430_vm0, %v390_v5  ;;  %v2239_v5 = vand.u32 127, %v978_v3 }
  0x5f   : > { %1641 = vmatpush.xpose.msk.msrb.mxu2 %vm430_vm0, %v406_v7 }
  0x60   : > { %1658 = vmatpush.xpose.msk.msrb.mxu3 %vm430_vm0, %v422_v8  ;;  %v989_v7 = vadd.s32 %v2237_v4, %v2239_v5 }
  0x61   : > { %1608 = vmatpush.xpose.msk.msrb.mxu0 %vm430_vm0, %v373_v9 }
  0x62   : > { %1625 = vmatpush.xpose.msk.msrb.mxu1 %vm430_vm0, %v389_v10  ;;  %v980_v10 = vadd.s32 128, %v2239_v5  ;;  %vm997_vm1 = vcmp.lt.s32.totalorder %v989_v7, 2000 }
  0x63   : > { %1642 = vmatpush.xpose.msk.msrb.mxu2 %vm430_vm0, %v405_v11  ;;  %v981_v11 = vadd.s32 256, %v2239_v5 }
  0x64   : > { %1659 = vmatpush.xpose.msk.msrb.mxu3 %vm430_vm0, %v421_v12 }
  0x65   : > { %1609 = vmatpush.xpose.msk.msrb.mxu0 %vm430_vm0, %v372_v13  ;;  %v990_v13 = vadd.s32 %v2237_v4, %v980_v10 }
  0x66   : > { %1626 = vmatpush.xpose.msk.msrb.mxu1 %vm430_vm0, %v388_v14 }
  0x67   : > { %1643 = vmatpush.xpose.msk.msrb.mxu2 %vm430_vm0, %v404_v15  ;;  %vm998_vm2 = vcmp.lt.s32.totalorder %v990_v13, 2000 }
  0x68   : > { %1660 = vmatpush.xpose.msk.msrb.mxu3 %vm430_vm0, %v420_v16 }
  0x69   : > { %1610 = vmatpush.xpose.msk.msrb.mxu0 %vm430_vm0, %v371_v17 }
  0x6a   : > { %1627 = vmatpush.xpose.msk.msrb.mxu1 %vm430_vm0, %v387_v18  ;;  %v991_v18 = vadd.s32 %v2237_v4, %v981_v11 }
  0x6b   : > { %1644 = vmatpush.xpose.msk.msrb.mxu2 %vm430_vm0, %v403_v19 }
  0x6c   : > { %1661 = vmatpush.xpose.msk.msrb.mxu3 %vm430_vm0, %v419_v20  ;;  %vm999_vm3 = vcmp.lt.s32.totalorder %v991_v18, 2000  ;;  %v983_v18 = vadd.s32 512, %v2239_v5 }
  0x6d   : > { %1611 = vmatpush.xpose.msk.msrb.mxu0 %vm430_vm0, %v370_v21 }
  0x6e   : > { %1628 = vmatpush.xpose.msk.msrb.mxu1 %vm430_vm0, %v386_v22 }
  0x6f   : > { %1645 = vmatpush.xpose.msk.msrb.mxu2 %vm430_vm0, %v402_v24 }
  0x70   : > { %1662 = vmatpush.xpose.msk.msrb.mxu3 %vm430_vm0, %v418_v25 }
  0x71   : > { %1612 = vmatpush.xpose.msk.msrb.mxu0 %vm430_vm0, %v369_v27 }
  0x72   : > { %1629 = vmatpush.xpose.msk.msrb.mxu1 %vm430_vm0, %v385_v28 }
  0x73   : > { %1646 = vmatpush.xpose.msk.msrb.mxu2 %vm430_vm0, %v401_v29 }
  0x74   : > { %1663 = vmatpush.xpose.msk.msrb.mxu3 %vm430_vm0, %v417_v30 }
  0x75   : > { %1613 = vmatpush.xpose.msk.msrb.mxu0 %vm430_vm0, %v368_v31 }
  0x76   : > { %1630 = vmatpush.xpose.msk.msrb.mxu1 %vm430_vm0, %v384_v32 }
  0x77   : > { %1647 = vmatpush.xpose.msk.msrb.mxu2 %vm430_vm0, %v400_v33 }
  0x78   : > { %1664 = vmatpush.xpose.msk.msrb.mxu3 %vm430_vm0, %v416_v34 }
  0x79   : > { %1614 = vmatpush.xpose.msk.msrb.mxu0 %vm430_vm0, %v367_v35 }
  0x7a   : > { %1631 = vmatpush.xpose.msk.msrb.mxu1 %vm430_vm0, %v383_v36 }
  0x7b   : > { %1648 = vmatpush.xpose.msk.msrb.mxu2 %vm430_vm0, %v399_v37 }
  0x7c   : > { %1665 = vmatpush.xpose.msk.msrb.mxu3 %vm430_vm0, %v415_v38 }
  0x7d   : > { %1615 = vmatpush.xpose.msk.msrb.mxu0 %vm430_vm0, %v366_v39 }
  0x7e   : > { %1632 = vmatpush.xpose.msk.msrb.mxu1 %vm430_vm0, %v382_v40 }
  0x7f   : > { %1649 = vmatpush.xpose.msk.msrb.mxu2 %vm430_vm0, %v398_v41 }
  0x80   : > { %1666 = vmatpush.xpose.msk.msrb.mxu3 %vm430_vm0, %v414_v42 }
  0x81   : > { %1616 = vmatpush.xpose.msk.msrb.mxu0 %vm430_vm0, %v365_v43 }
  0x82   : > { %1633 = vmatpush.xpose.msk.msrb.mxu1 %vm430_vm0, %v381_v44  ;;  %v2267_v44 = vshrl.u32 %v978_v3, 7 }
  0x83   : > { %1650 = vmatpush.xpose.msk.msrb.mxu2 %vm430_vm0, %v397_v45 }
  0x84   : > { %1667 = vmatpush.xpose.msk.msrb.mxu3 %vm430_vm0, %v413_v46 }
  0x85   : > { %1617 = vmatpush.xpose.msk.msrb.mxu0 %vm430_vm0, %v364_v47 }
  0x86   : > { %1634 = vmatpush.xpose.msk.msrb.mxu1 %vm430_vm0, %v380_v48 }
  0x87   : > { %1651 = vmatpush.xpose.msk.msrb.mxu2 %vm430_vm0, %v396_v49 }
  0x88   : > { %1668 = vmatpush.xpose.msk.msrb.mxu3 %vm430_vm0, %v412_v50 }
  0x89   : > { %1618 = vmatpush.xpose.msk.msrb.mxu0 %vm430_vm0, %v363_v51 }
  0x8a   : > { %1635 = vmatpush.xpose.msk.msrb.mxu1 %vm430_vm0, %v379_v52 }
  0x8b   : > { %1652 = vmatpush.xpose.msk.msrb.mxu2 %vm430_vm0, %v395_v53 }
  0x8c   : > { %1669 = vmatpush.xpose.msk.msrb.mxu3 %vm430_vm0, %v411_v54 }
  0x8d   : > { %1619 = vmatpush.xpose.msk.msrb.mxu0 %vm430_vm0, %v362_v55 }
  0x8e   : > { %1636 = vmatpush.xpose.msk.msrb.mxu1 %vm430_vm0, %v378_v56 }
  0x8f   : > { %1653 = vmatpush.xpose.msk.msrb.mxu2 %vm430_vm0, %v394_v57 }
  0x90   : > { %1670 = vmatpush.xpose.msk.msrb.mxu3 %vm430_vm0, %v410_v58 }
  0x91   : > { %1620 = vmatpush.xpose.msk.msrb.mxu0 %vm430_vm0, %v361_v59 }
  0x92   : > { %1637 = vmatpush.xpose.msk.msrb.mxu1 %vm430_vm0, %v377_v60 }
  0x93   : > { %1654 = vmatpush.xpose.msk.msrb.mxu2 %vm430_vm0, %v393_v61 }
  0x94   : > { %1671 = vmatpush.xpose.msk.msrb.mxu3 %vm430_vm0, %v409_v62 }
  0x95   : > { %1621 = vmatpush.xpose.msk.msrb.mxu0 %vm430_vm0, %v360_v63 }
  0x96   : > { %1638 = vmatpush.xpose.msk.msrb.mxu1 %vm430_vm0, %v376_v0 }
  0x97   : > { %1655 = vmatpush.xpose.msk.msrb.mxu2 %vm430_vm0, %v392_v1 }
  0x98   : > { %1672 = vmatpush.xpose.msk.msrb.mxu3 %vm430_vm0, %v408_v2  ;;  %1622 = vmatmul.msk.f32.vlgmr.msrb.gmra.mxu0 %vm430_vm0, %v2097_v6 }
  0x99   : > { %1639 = vmatmul.msk.f32.vlgmr.msrb.gmra.mxu1 %vm430_vm0, %v2097_v6 }
  0x9a   : > { %1656 = vmatmul.msk.f32.vlgmr.msrb.gmra.mxu2 %vm430_vm0, %v2097_v6 }
  0x9b   : > { %1673 = vmatmul.msk.f32.vlgmr.msrb.gmra.mxu3 %vm430_vm0, %v2097_v6  ;;  %v982_v6 = vadd.s32 384, %v2239_v5 }
  0x9d   : > { %v992_v21 = vadd.s32 %v2237_v4, %v982_v6 }
  0x9f   : > { %vm1000_vm4 = vcmp.lt.s32.totalorder %v992_v21, 2000  ;;  %v986_v21 = vadd.s32 896, %v2239_v5 }
  0xa8   : > { %v2251_v12 = vpop.permute.xlu0 %427 }
  0xd5   : > { %v835_v8 = vpop.f32.mrf.mxu0 }
  0xd6   : > { %v855_v9 = vpop.f32.mrf.mxu1  ;;  %v836_v15 = vadd.f32 %v835_v8, %v2251_v12 }
  0xd7   : > { %v856_v16 = vadd.f32 %v855_v9, %v2251_v12 }
  0xd8   : > { %v1005_v22 = vsel %vm997_vm1, %v836_v15, -1e+30 }
  0xd9   : > { %v1006_v23 = vsel %vm998_vm2, %v856_v16, -1e+30  ;;  %1013 = vst [vmem:[%s2261_s28] sm:$0xff] %v1005_v22  ;;  %v1032_v24 = vrot.slane %v1005_v22, 4 }
  0xda   : > { %v1038_v25 = vrot.slane %v1006_v23, 4  ;;  %1014 = vst [vmem:[%s2261_s28 + $0x8] sm:$0xff] %v1006_v23 }
  0xdb   : > { %v1033_v29 = vmax.f32 %v1005_v22, %v1032_v24  ;;  %v2294_v24 = vld [vmem:[%s290_s13] sm:$0xff] }
  0xdc   : > { %v1039_v30 = vmax.f32 %v1006_v23, %v1038_v25  ;;  %v2296_v25 = vld [vmem:[%s290_s13 + $0x8] sm:$0xff] }
  0xdd   : > { %v875_v14 = vpop.f32.mrf.mxu2  ;;  %v1034_v33 = vrot.slane %v1033_v29, 2 }
  0xde   : > { %v876_v17 = vadd.f32 %v875_v14, %v2251_v12  ;;  %v895_v19 = vpop.f32.mrf.mxu3  ;;  %v1040_v34 = vrot.slane %v1039_v30, 2 }
  0xdf   : > { %v896_v20 = vadd.f32 %v895_v19, %v2251_v12  ;;  %v1035_v37 = vmax.f32 %v1033_v29, %v1034_v33  ;;  %v984_v19 = vadd.s32 640, %v2239_v5  ;;  %v2305_v29 = vld [vmem:[%s290_s13 + $0x20] sm:$0xff]  ;;  %v2313_v33 = vadd.s32 %v2237_v4, %v986_v21 }
  0xe0   : > { %v1007_v26 = vsel %vm999_vm3, %v876_v17, -1e+30  ;;  %v1041_v38 = vmax.f32 %v1039_v30, %v1040_v34  ;;  %v1192_v30 = vrot.slane %v2294_v24, 4  ;;  %v2315_v34 = vld [vmem:[%s290_s13 + $0x30] sm:$0xff] }
  0xe1   : > { %v1044_v27 = vrot.slane %v1007_v26, 4  ;;  %v1008_v28 = vsel %vm1000_vm4, %v896_v20, -1e+30  ;;  %1015 = vst [vmem:[%s2261_s28 + $0x10] sm:$0xff] %v1007_v26  ;;  %v1036_v41 = vrot.slane %v1035_v37, 1  ;;  %v985_v20 = vadd.s32 768, %v2239_v5 }
  0xe2   : > { %v1050_v31 = vrot.slane %v1008_v28, 4  ;;  %1016 = vst [vmem:[%s2261_s28 + $0x18] sm:$0xff] %v1008_v28  ;;  %v1042_v42 = vrot.slane %v1041_v38, 1  ;;  %v2307_v5 = vld [vmem:[%s290_s13 + $0x28] sm:$0xff] }
  0xe3   : > { %v1045_v32 = vmax.f32 %v1007_v26, %v1044_v27  ;;  %v1037_v46 = vmax.f32 %v1035_v37, %v1036_v41  ;;  %v2301_v27 = vadd.s32 %v2237_v4, %v985_v20  ;;  %v1216_v37 = vrot.slane %v2305_v29, 4 }
  0xe4   : > { %v1051_v35 = vmax.f32 %v1008_v28, %v1050_v31  ;;  %v1043_v47 = vmax.f32 %v1041_v38, %v1042_v42  ;;  %v1198_v31 = vrot.slane %v2296_v25, 4  ;;  %v1222_v38 = vrot.slane %v2307_v5, 4 }
  0xe5   : > { %v1046_v36 = vrot.slane %v1045_v32, 2  ;;  %vm1080_vm5 = vcmp.eq.f32.partialorder %v1005_v22, %v1037_v46  ;;  %v2289_v22 = vadd.s32 %v2237_v4, %v983_v18  ;;  %v1228_v42 = vrot.slane %v2315_v34, 4 }
  0xe6   : > { %v1052_v39 = vrot.slane %v1051_v35, 2  ;;  %vm1081_vm6 = vcmp.eq.f32.partialorder %v1006_v23, %v1043_v47  ;;  %v1088_v51 = vsel %vm1080_vm5, %v2267_v44, 8  ;;  %v2292_v23 = vadd.s32 %v2237_v4, %v984_v19 }
  0xe7   : > { %v1047_v40 = vmax.f32 %v1045_v32, %v1046_v36  ;;  %v1089_v52 = vsel %vm1081_vm6, %v2267_v44, 8  ;;  %v1096_v53 = vrot.slane %v1088_v51, 4  ;;  %vm1001_vm5 = vcmp.lt.s32.totalorder %v2289_v22, 2000 }
  0xe8   : > { %v1053_v43 = vmax.f32 %v1051_v35, %v1052_v39  ;;  %v1105_v54 = vrot.slane %v1089_v52, 4  ;;  %v2317_v35 = vld [vmem:[%s290_s13 + $0x38] sm:$0xff]  ;;  %v1193_v39 = vmax.f32 %v2294_v24, %v1192_v30  ;;  %vm1002_vm6 = vcmp.lt.s32.totalorder %v2292_v23, 2000 }
  0xe9   : > { %v1048_v45 = vrot.slane %v1047_v40, 1  ;;  %vm1097_vm9 = vcmp.lt.s32.totalorder %v1088_v51, %v1096_v53  ;;  %v1234_v46 = vrot.slane %v2317_v35, 4 }
  0xea   : > { %v1054_v48 = vrot.slane %v1053_v43, 1  ;;  %vm1106_vm10 = vcmp.lt.s32.totalorder %v1089_v52, %v1105_v54  ;;  %v1098_v59 = vsel %vm1097_vm9, %v1088_v51, %v1096_v53  ;;  %v1194_v47 = vrot.slane %v1193_v39, 2 }
  0xeb   : > { %v1049_v49 = vmax.f32 %v1047_v40, %v1048_v45  ;;  %v1107_v60 = vsel %vm1106_vm10, %v1089_v52, %v1105_v54  ;;  %v1099_v61 = vrot.slane %v1098_v59, 2  ;;  %v1199_v40 = vmax.f32 %v2296_v25, %v1198_v31 }
  0xec   : > { %v1055_v50 = vmax.f32 %v1053_v43, %v1054_v48  ;;  %v1108_v62 = vrot.slane %v1107_v60, 2  ;;  %v1217_v43 = vmax.f32 %v2305_v29, %v1216_v37  ;;  %v1223_v45 = vmax.f32 %v2307_v5, %v1222_v38 }
  0xed   : > { %vm1082_vm7 = vcmp.eq.f32.partialorder %v1007_v26, %v1049_v49  ;;  %vm1100_vm13 = vcmp.lt.s32.totalorder %v1098_v59, %v1099_v61  ;;  %v2298_v26 = vld [vmem:[%s290_s13 + $0x10] sm:$0xff]  ;;  %v1200_v48 = vrot.slane %v1199_v40, 2  ;;  %v1235_v54 = vmax.f32 %v2317_v35, %v1234_v46 }
  0xee   : > { %v1090_v55 = vsel %vm1082_vm7, %v2267_v44, 8  ;;  %vm1083_vm8 = vcmp.eq.f32.partialorder %v1008_v28, %v1055_v50  ;;  %vm1109_vm14 = vcmp.lt.s32.totalorder %v1107_v60, %v1108_v62  ;;  %v1101_v3 = vsel %vm1100_vm13, %v1098_v59, %v1099_v61  ;;  %v2303_v28 = vld [vmem:[%s290_s13 + $0x18] sm:$0xff] }
  0xef   : > { %v1114_v56 = vrot.slane %v1090_v55, 4  ;;  %v1091_v57 = vsel %vm1083_vm8, %v2267_v44, 8  ;;  %v1110_v7 = vsel %vm1109_vm14, %v1107_v60, %v1108_v62  ;;  %v1102_v8 = vrot.slane %v1101_v3, 1 }
  0xf0   : > { %v1123_v58 = vrot.slane %v1091_v57, 4  ;;  %v1111_v9 = vrot.slane %v1110_v7, 1  ;;  %v1204_v32 = vrot.slane %v2298_v26, 4  ;;  %v1210_v36 = vrot.slane %v2303_v28, 4 }
  0xf1   : > { %vm1115_vm11 = vcmp.lt.s32.totalorder %v1090_v55, %v1114_v56  ;;  %vm1103_vm1 = vcmp.lt.s32.totalorder %v1101_v3, %v1102_v8  ;;  %v1229_v50 = vmax.f32 %v2315_v34, %v1228_v42  ;;  %v1218_v52 = vrot.slane %v1217_v43, 2 }
  0xf2   : > { %v1116_v63 = vsel %vm1115_vm11, %v1090_v55, %v1114_v56  ;;  %vm1124_vm12 = vcmp.lt.s32.totalorder %v1091_v57, %v1123_v58  ;;  %vm1112_vm2 = vcmp.lt.s32.totalorder %v1110_v7, %v1111_v9  ;;  %v1104_v14 = vsel %vm1103_vm1, %v1101_v3, %v1102_v8 }
  0xf3   : > { %v1117_v0 = vrot.slane %v1116_v63, 2  ;;  %v1125_v1 = vsel %vm1124_vm12, %v1091_v57, %v1123_v58  ;;  %v1113_v15 = vsel %vm1112_vm2, %v1110_v7, %v1111_v9  ;;  %1168 = vst [vmem:[%s2275_s10] sm:$0xff] %v1104_v14  ;;  %v1205_v41 = vmax.f32 %v2298_v26, %v1204_v32 }
  0xf4   : > { %v1126_v2 = vrot.slane %v1125_v1, 2  ;;  %1169 = vst [vmem:[%s2275_s10 + $0x8] sm:$0xff] %v1113_v15  ;;  %v1211_v4 = vmax.f32 %v2303_v28, %v1210_v36  ;;  %v1224_v53 = vrot.slane %v1223_v45, 2  ;;  %v1195_v55 = vmax.f32 %v1193_v39, %v1194_v47 }
  0xf5   : > { %vm1118_vm15 = vcmp.lt.s32.totalorder %v1116_v63, %v1117_v0  ;;  %v1206_v49 = vrot.slane %v1205_v41, 2  ;;  %v1201_v56 = vmax.f32 %v1199_v40, %v1200_v48  ;;  %v1230_v58 = vrot.slane %v1229_v50, 2 }
  0xf6   : > { %v1119_v10 = vsel %vm1118_vm15, %v1116_v63, %v1117_v0  ;;  %vm1127_vm0 = vcmp.lt.s32.totalorder %v1125_v1, %v1126_v2  ;;  %v1212_v51 = vrot.slane %v1211_v4, 2  ;;  %v1219_v60 = vmax.f32 %v1217_v43, %v1218_v52 }
  0xf7   : > { %v1120_v11 = vrot.slane %v1119_v10, 1  ;;  %v1128_v6 = vsel %vm1127_vm0, %v1125_v1, %v1126_v2  ;;  %v1207_v57 = vmax.f32 %v1205_v41, %v1206_v49  ;;  %v1225_v61 = vmax.f32 %v1223_v45, %v1224_v53 }
  0xf8   : > { %v1129_v13 = vrot.slane %v1128_v6, 1  ;;  %v1213_v59 = vmax.f32 %v1211_v4, %v1212_v51  ;;  %v1236_v62 = vrot.slane %v1235_v54, 2  ;;  %v1196_v63 = vrot.slane %v1195_v55, 1 }
  0xf9   : > { %vm1121_vm3 = vcmp.lt.s32.totalorder %v1119_v10, %v1120_v11  ;;  %v1202_v0 = vrot.slane %v1201_v56, 1  ;;  %v1208_v1 = vrot.slane %v1207_v57, 1  ;;  %v1231_v2 = vmax.f32 %v1229_v50, %v1230_v58 }
  0xfa   : > { %v1122_v16 = vsel %vm1121_vm3, %v1119_v10, %v1120_v11  ;;  %vm1130_vm4 = vcmp.lt.s32.totalorder %v1128_v6, %v1129_v13  ;;  %v1214_v3 = vrot.slane %v1213_v59, 1  ;;  %v1220_v7 = vrot.slane %v1219_v60, 1 }
  0xfb   : > { %v1131_v17 = vsel %vm1130_vm4, %v1128_v6, %v1129_v13  ;;  %1170 = vst [vmem:[%s2275_s10 + $0x10] sm:$0xff] %v1122_v16  ;;  %v1226_v8 = vrot.slane %v1225_v61, 1  ;;  %v1237_v9 = vmax.f32 %v1235_v54, %v1236_v62  ;;  %v1197_v10 = vmax.f32 %v1195_v55, %v1196_v63 }
  0xfc   : > { %1171 = vst [vmem:[%s2275_s10 + $0x18] sm:$0xff] %v1131_v17  ;;  %v1203_v11 = vmax.f32 %v1201_v56, %v1202_v0  ;;  %v1209_v6 = vmax.f32 %v1207_v57, %v1208_v1  ;;  %v1232_v13 = vrot.slane %v1231_v2, 1  ;;  %v1215_v14 = vmax.f32 %v1213_v59, %v1214_v3 }
  0xfd   : > { %v1221_v15 = vmax.f32 %v1219_v60, %v1220_v7  ;;  %v1227_v16 = vmax.f32 %v1225_v61, %v1226_v8  ;;  %v1238_v17 = vrot.slane %v1237_v9, 1  ;;  %vm1240_vm7 = vcmp.eq.f32.partialorder %v2294_v24, %v1197_v10 }
  0xfe   : > { %v1233_v18 = vmax.f32 %v1231_v2, %v1232_v13  ;;  %vm1241_vm8 = vcmp.eq.f32.partialorder %v2296_v25, %v1203_v11  ;;  %vm1242_vm9 = vcmp.eq.f32.partialorder %v2298_v26, %v1209_v6  ;;  %vm1243_vm10 = vcmp.eq.f32.partialorder %v2303_v28, %v1215_v14 }
  0xff   : > { %v1239_v19 = vmax.f32 %v1237_v9, %v1238_v17  ;;  %vm1244_vm11 = vcmp.eq.f32.partialorder %v2305_v29, %v1221_v15  ;;  %vm1245_vm12 = vcmp.eq.f32.partialorder %v2307_v5, %v1227_v16  ;;  %v1248_v20 = vsel %vm1240_vm7, %v2267_v44, 8 }
 0x100   : > { %vm1246_vm13 = vcmp.eq.f32.partialorder %v2315_v34, %v1233_v18  ;;  %v1249_v21 = vsel %vm1241_vm8, %v2267_v44, 8  ;;  %v1250_v30 = vsel %vm1242_vm9, %v2267_v44, 8  ;;  %v1251_v24 = vsel %vm1243_vm10, %v2267_v44, 8 }
 0x101   : > { %vm1247_vm14 = vcmp.eq.f32.partialorder %v2317_v35, %v1239_v19  ;;  %v1252_v25 = vsel %vm1244_vm11, %v2267_v44, 8  ;;  %v1253_v26 = vsel %vm1245_vm12, %v2267_v44, 8  ;;  %v2349_v28 = vsel %vm1246_vm13, %v2267_v44, 8 }
 0x102   : > { %v2352_v29 = vsel %vm1247_vm14, %v2267_v44, 8  ;;  %v1256_v5 = vrot.slane %v1248_v20, 4  ;;  %v1265_v31 = vrot.slane %v1249_v21, 4  ;;  %v1274_v32 = vrot.slane %v1250_v30, 4 }
 0x103   : > { %v1283_v34 = vrot.slane %v1251_v24, 4  ;;  %v1292_v36 = vrot.slane %v1252_v25, 4  ;;  %v1301_v37 = vrot.slane %v1253_v26, 4  ;;  %vm1003_vm15 = vcmp.lt.s32.totalorder %v2301_v27, 2000 }
 0x104   : > { %vm1004_vm0 = vcmp.lt.s32.totalorder %v2313_v33, 2000  ;;  %vm1257_vm1 = vcmp.lt.s32.totalorder %v1248_v20, %v1256_v5  ;;  %vm1266_vm2 = vcmp.lt.s32.totalorder %v1249_v21, %v1265_v31  ;;  %v1310_v35 = vrot.slane %v2349_v28, 4 }
 0x105   : > { %v1319_v38 = vrot.slane %v2352_v29, 4  ;;  %v1258_v41 = vsel %vm1257_vm1, %v1248_v20, %v1256_v5  ;;  %v1267_v42 = vsel %vm1266_vm2, %v1249_v21, %v1265_v31  ;;  %vm1275_vm3 = vcmp.lt.s32.totalorder %v1250_v30, %v1274_v32 }
 0x106   : > { %vm1284_vm4 = vcmp.lt.s32.totalorder %v1251_v24, %v1283_v34  ;;  %v1259_v45 = vrot.slane %v1258_v41, 2  ;;  %v1268_v46 = vrot.slane %v1267_v42, 2  ;;  %v1276_v47 = vsel %vm1275_vm3, %v1250_v30, %v1274_v32 }
 0x107   : > { %v1285_v48 = vsel %vm1284_vm4, %v1251_v24, %v1283_v34  ;;  %vm2363_vm7 = vcmp.lt.s32.totalorder %v1252_v25, %v1292_v36  ;;  %vm2367_vm8 = vcmp.lt.s32.totalorder %v1253_v26, %v1301_v37  ;;  %v1277_v57 = vrot.slane %v1276_v47, 2 }
 0x108   : > { %vm1260_vm9 = vcmp.lt.s32.totalorder %v1258_v41, %v1259_v45  ;;  %vm1269_vm10 = vcmp.lt.s32.totalorder %v1267_v42, %v1268_v46  ;;  %v1286_v58 = vrot.slane %v1285_v48, 2  ;;  %v2393_v61 = vsel %vm2363_vm7, %v1252_v25, %v1292_v36 }
 0x109   : > { %v1261_v22 = vsel %vm1260_vm9, %v1258_v41, %v1259_v45  ;;  %v1270_v55 = vsel %vm1269_vm10, %v1267_v42, %v1268_v46  ;;  %v2397_v62 = vsel %vm2367_vm8, %v1253_v26, %v1301_v37  ;;  %vm1278_vm11 = vcmp.lt.s32.totalorder %v1276_v47, %v1277_v57 }
 0x10a   : > { %v1262_v23 = vrot.slane %v1261_v22, 1  ;;  %v1271_v56 = vrot.slane %v1270_v55, 1  ;;  %vm1287_vm12 = vcmp.lt.s32.totalorder %v1285_v48, %v1286_v58  ;;  %v1279_v10 = vsel %vm1278_vm11, %v1276_v47, %v1277_v57 }
 0x10b   : > { %v1288_v11 = vsel %vm1287_vm12, %v1285_v48, %v1286_v58  ;;  %v1280_v16 = vrot.slane %v1279_v10, 1  ;;  %v1295_v19 = vrot.slane %v2393_v61, 2  ;;  %v1304_v20 = vrot.slane %v2397_v62, 2 }
 0x10c   : > { %v1289_v33 = vrot.slane %v1288_v11, 1 }
 0x115   : > { %v915_v39 = vpop.f32.mrf.mxu0 }
 0x116   : > { %v935_v40 = vpop.f32.mrf.mxu1  ;;  %v916_v4 = vadd.f32 %v915_v39, %v2251_v12 }
 0x117   : > { %v936_v43 = vadd.f32 %v935_v40, %v2251_v12 }
 0x118   : > { %v2373_v51 = vsel %vm1001_vm5, %v916_v4, -1e+30  ;;  %vm1263_vm5 = vcmp.lt.s32.totalorder %v1261_v22, %v1262_v23 }
 0x119   : > { %v2377_v52 = vsel %vm1002_vm6, %v936_v43, -1e+30  ;;  %1017 = vst [vmem:[%s2261_s28 + $0x20] sm:$0xff] %v2373_v51  ;;  %v1056_v53 = vrot.slane %v2373_v51, 4  ;;  %vm1272_vm6 = vcmp.lt.s32.totalorder %v1270_v55, %v1271_v56  ;;  %v1264_v8 = vsel %vm1263_vm5, %v1261_v22, %v1262_v23 }
 0x11a   : > { %v1062_v54 = vrot.slane %v2377_v52, 4  ;;  %1018 = vst [vmem:[%s2261_s28 + $0x28] sm:$0xff] %v2377_v52  ;;  %v1273_v9 = vsel %vm1272_vm6, %v1270_v55, %v1271_v56 }
 0x11b   : > { %v1057_v59 = vmax.f32 %v2373_v51, %v1056_v53  ;;  %1328 = vst [vmem:[%s2416_s9] sm:$0xff] %v1264_v8 }
 0x11c   : > { %v1063_v60 = vmax.f32 %v2377_v52, %v1062_v54 }
 0x11d   : > { %v955_v63 = vpop.f32.mrf.mxu2  ;;  %v1058_v1 = vrot.slane %v1057_v59, 2 }
 0x11e   : > { %v975_v0 = vpop.f32.mrf.mxu3  ;;  %v1064_v2 = vrot.slane %v1063_v60, 2  ;;  %v956_v3 = vadd.f32 %v955_v63, %v2251_v12 }
 0x11f   : > { %v976_v7 = vadd.f32 %v975_v0, %v2251_v12  ;;  %v1059_v6 = vmax.f32 %v1057_v59, %v1058_v1 }
 0x120   : > { %v1065_v13 = vmax.f32 %v1063_v60, %v1064_v2  ;;  %v2406_v14 = vsel %vm1003_vm15, %v956_v3, -1e+30 }
 0x121   : > { %v2410_v15 = vsel %vm1004_vm0, %v976_v7, -1e+30  ;;  %1019 = vst [vmem:[%s2261_s28 + $0x30] sm:$0xff] %v2406_v14  ;;  %v1068_v12 = vrot.slane %v2406_v14, 4  ;;  %v1060_v17 = vrot.slane %v1059_v6, 1 }
 0x122   : > { %v1074_v27 = vrot.slane %v2410_v15, 4  ;;  %v1066_v18 = vrot.slane %v1065_v13, 1  ;;  %1020 = vst [vmem:[%s2261_s28 + $0x38] sm:$0xff] %v2410_v15 }
 0x123   : > { %v1069_v21 = vmax.f32 %v2406_v14, %v1068_v12 }
 0x124   : > { %v1075_v30 = vmax.f32 %v2410_v15, %v1074_v27 }
 0x125   : > { %1767 = shalt.err (!%p1764_p4)
}
 0x126   : > { %1689 = dma.vmem_to_hbm [thread:$0]  (%p1940_p5), %s2412_s18, 1024, %s1363_s29, %s1337_s20   ;;  %vm1281_vm13 = vcmp.lt.s32.totalorder %v1279_v10, %v1280_v16  ;;  %vm1290_vm14 = vcmp.lt.s32.totalorder %v1288_v11, %v1289_v33  ;;  %1329 = vst [vmem:[%s2416_s9 + $0x8] sm:$0xff] %v1273_v9  ;;  %v1061_v24 = vmax.f32 %v1059_v6, %v1060_v17  ;;  %v1067_v25 = vmax.f32 %v1065_v13, %v1066_v18 }
 0x127   : > { %v1282_v26 = vsel %vm1281_vm13, %v1279_v10, %v1280_v16  ;;  %v1291_v5 = vsel %vm1290_vm14, %v1288_v11, %v1289_v33  ;;  %v1070_v31 = vrot.slane %v1069_v21, 2  ;;  %v1076_v32 = vrot.slane %v1075_v30, 2  ;;  %s1373_s29 = scalar_lea.hbm %s2561_s5, %s2361_s14  ;;  %s1388_s12 = scalar_lea.hbm %s2562_s6, %s2361_s14 }
 0x128   : > { %vm1296_vm15 = vcmp.lt.s32.totalorder %v2393_v61, %v1295_v19  ;;  %vm1305_vm0 = vcmp.lt.s32.totalorder %v2397_v62, %v1304_v20  ;;  %1330 = vst [vmem:[%s2416_s9 + $0x10] sm:$0xff] %v1282_v26  ;;  %vm1084_vm1 = vcmp.eq.f32.partialorder %v2373_v51, %v1061_v24  ;;  %vm1085_vm2 = vcmp.eq.f32.partialorder %v2377_v52, %v1067_v25  ;;  %s1341_s13 = sand.u32 1, %s1921_s25   ;;  %s1375_s28 = sshll.u32 %s2275_s10, 4  ;;  %s1376_s28 = int_to_ptr.vmem [resolvable:$true] %s1375_s28 }
 0x129   : > { %v1297_v34 = vsel %vm1296_vm15, %v2393_v61, %v1295_v19  ;;  %v1306_v36 = vsel %vm1305_vm0, %v2397_v62, %v1304_v20  ;;  %1331 = vst [vmem:[%s2416_s9 + $0x18] sm:$0xff] %v1291_v5  ;;  %v1092_v37 = vsel %vm1084_vm1, %v2267_v44, 8  ;;  %v1093_v39 = vsel %vm1085_vm2, %v2267_v44, 8  ;;  %s2499_s15 = sshll.u32 %s1373_s29, 4  ;;  %s2501_s16 = sshll.u32 %s1388_s12, 4  ;;  %s1378_s15 = int_to_ptr.hbm [resolvable:$true] %s2499_s15  ;;  %s1393_s16 = int_to_ptr.hbm [resolvable:$true] %s2501_s16 }
 0x12a   : > { %v1071_v40 = vmax.f32 %v1069_v21, %v1070_v31  ;;  %v1077_v41 = vmax.f32 %v1075_v30, %v1076_v32  ;;  %v1132_v42 = vrot.slane %v1092_v37, 4  ;;  %v1141_v4 = vrot.slane %v1093_v39, 4  ;;  %s1390_s14 = sshll.u32 %s2416_s9, 4  ;;  %s1342_s25 = scalar_lea.sflag [#allocation5], %s1341_s13  ;;  %s2508_s14 = int_to_ptr.vmem [resolvable:$true] %s1390_s14 }
 0x12b   : > { %v1298_v43 = vrot.slane %v1297_v34, 1  ;;  %v1307_v45 = vrot.slane %v1306_v36, 1  ;;  %vm2460_vm3 = vcmp.lt.s32.totalorder %v2349_v28, %v1310_v35  ;;  %vm2467_vm4 = vcmp.lt.s32.totalorder %v2352_v29, %v1319_v38  ;;  %s1782_s17 = sshra.s32 %s1378_s15, 4  ;;  %s1788_s20 = scalar_lea.hbm %s2561_s5, 128  ;;  %s1783_s17 = int_to_ptr.hbm [resolvable:$true] %s1782_s17 }
 0x12c   : > { %v1072_v46 = vrot.slane %v1071_v40, 1  ;;  %v1078_v47 = vrot.slane %v1077_v41, 1  ;;  %vm1133_vm7 = vcmp.lt.s32.totalorder %v1092_v37, %v1132_v42  ;;  %vm1142_vm8 = vcmp.lt.s32.totalorder %v1093_v39, %v1141_v4  ;;  %s1784_s19 = scalar_lea.hbm %s1783_s17, 64  ;;  %p1789_p10 = scmp.lt.s32.totalorder %s1783_s17, %s2561_s5 }
 0x12d   : > { %vm1299_vm9 = vcmp.lt.s32.totalorder %v1297_v34, %v1298_v43  ;;  %vm1308_vm10 = vcmp.lt.s32.totalorder %v1306_v36, %v1307_v45  ;;  %v1134_v50 = vsel %vm1133_vm7, %v1092_v37, %v1132_v42  ;;  %v1143_v51 = vsel %vm1142_vm8, %v1093_v39, %v1141_v4  ;;  %p1785_p7 = scmp.ne.s32.totalorder %s1783_s17, %s1784_s19  ;;  %p1790_p11 = scmp.lt.s32.totalorder %s1788_s20, %s1784_s19 }
 0x12e   : > { %v1073_v52 = vmax.f32 %v1071_v40, %v1072_v46  ;;  %v1079_v53 = vmax.f32 %v1077_v41, %v1078_v47  ;;  %v1135_v54 = vrot.slane %v1134_v50, 2  ;;  %v1144_v22 = vrot.slane %v1143_v51, 2 }
 0x12f   : > { %v1300_v55 = vsel %vm1299_vm9, %v1297_v34, %v1298_v43  ;;  %v1309_v23 = vsel %vm1308_vm10, %v1306_v36, %v1307_v45  ;;  %v1312_v56 = vsel %vm2460_vm3, %v2349_v28, %v1310_v35  ;;  %v1321_v57 = vsel %vm2467_vm4, %v2352_v29, %v1319_v38  ;;  %p1786_p8 = pnand %p1785_p7, %p1940_p5  ;;  %p1791_p12 = por %p1790_p11, %p1789_p10 }
 0x130   : > { %vm1086_vm5 = vcmp.eq.f32.partialorder %v2406_v14, %v1073_v52  ;;  %vm1087_vm6 = vcmp.eq.f32.partialorder %v2410_v15, %v1079_v53  ;;  %1332 = vst [vmem:[%s2416_s9 + $0x20] sm:$0xff] %v1300_v55  ;;  %vm1136_vm11 = vcmp.lt.s32.totalorder %v1134_v50, %v1135_v54  ;;  %vm1145_vm12 = vcmp.lt.s32.totalorder %v1143_v51, %v1144_v22 }
 0x131   : > { %v1094_v58 = vsel %vm1086_vm5, %v2267_v44, 8  ;;  %v1095_v59 = vsel %vm1087_vm6, %v2267_v44, 8  ;;  %1333 = vst [vmem:[%s2416_s9 + $0x28] sm:$0xff] %v1309_v23  ;;  %v1137_v60 = vsel %vm1136_vm11, %v1134_v50, %v1135_v54  ;;  %v1146_v61 = vsel %vm1145_vm12, %v1143_v51, %v1144_v22  ;;  %p1787_p9 = pneg %p1786_p8 }
 0x132   : > { %v1150_v62 = vrot.slane %v1094_v58, 4  ;;  %v1159_v63 = vrot.slane %v1095_v59, 4  ;;  %v1138_v28 = vrot.slane %v1137_v60, 1  ;;  %v1147_v35 = vrot.slane %v1146_v61, 1 }
 0x133   : > { %v1313_v0 = vrot.slane %v1312_v56, 2  ;;  %v1322_v1 = vrot.slane %v1321_v57, 2  ;;  %p1792_p13 = pnand %p1791_p12, %p1787_p9 }
 0x134   : > { %vm1151_vm13 = vcmp.lt.s32.totalorder %v1094_v58, %v1150_v62  ;;  %vm1160_vm14 = vcmp.lt.s32.totalorder %v1095_v59, %v1159_v63  ;;  %vm1139_vm15 = vcmp.lt.s32.totalorder %v1137_v60, %v1138_v28  ;;  %vm1148_vm0 = vcmp.lt.s32.totalorder %v1146_v61, %v1147_v35 }
 0x135   : > { %v1152_v29 = vsel %vm1151_vm13, %v1094_v58, %v1150_v62  ;;  %v1161_v38 = vsel %vm1160_vm14, %v1095_v59, %v1159_v63  ;;  %v1140_v44 = vsel %vm1139_vm15, %v1137_v60, %v1138_v28  ;;  %v1149_v2 = vsel %vm1148_vm0, %v1146_v61, %v1147_v35 }
 0x136   : > { %v1153_v3 = vrot.slane %v1152_v29, 2  ;;  %v1162_v7 = vrot.slane %v1161_v38, 2  ;;  %1172 = vst [vmem:[%s2275_s10 + $0x20] sm:$0xff] %v1140_v44  ;;  %vm1314_vm1 = vcmp.lt.s32.totalorder %v1312_v56, %v1313_v0  ;;  %vm1323_vm2 = vcmp.lt.s32.totalorder %v1321_v57, %v1322_v1 }
 0x137   : > { %1173 = vst [vmem:[%s2275_s10 + $0x28] sm:$0xff] %v1149_v2  ;;  %v1315_v8 = vsel %vm1314_vm1, %v1312_v56, %v1313_v0  ;;  %v1324_v9 = vsel %vm1323_vm2, %v1321_v57, %v1322_v1 }
 0x138   : > { %vm1154_vm3 = vcmp.lt.s32.totalorder %v1152_v29, %v1153_v3  ;;  %vm1163_vm4 = vcmp.lt.s32.totalorder %v1161_v38, %v1162_v7  ;;  %v1316_v6 = vrot.slane %v1315_v8, 1  ;;  %v1325_v13 = vrot.slane %v1324_v9, 1 }
 0x139   : > { %v1155_v10 = vsel %vm1154_vm3, %v1152_v29, %v1153_v3  ;;  %v1164_v11 = vsel %vm1163_vm4, %v1161_v38, %v1162_v7 }
 0x13a   : > { %v1156_v14 = vrot.slane %v1155_v10, 1  ;;  %v1165_v15 = vrot.slane %v1164_v11, 1  ;;  %vm1317_vm7 = vcmp.lt.s32.totalorder %v1315_v8, %v1316_v6  ;;  %vm1326_vm8 = vcmp.lt.s32.totalorder %v1324_v9, %v1325_v13 }
 0x13b   : > { %v1318_v12 = vsel %vm1317_vm7, %v1315_v8, %v1316_v6  ;;  %v1327_v33 = vsel %vm1326_vm8, %v1324_v9, %v1325_v13 }
 0x13c   : > { %vm1157_vm9 = vcmp.lt.s32.totalorder %v1155_v10, %v1156_v14  ;;  %vm1166_vm10 = vcmp.lt.s32.totalorder %v1164_v11, %v1165_v15  ;;  %1334 = vst [vmem:[%s2416_s9 + $0x30] sm:$0xff] %v1318_v12 }
 0x13d   : > { %v1158_v27 = vsel %vm1157_vm9, %v1155_v10, %v1156_v14  ;;  %v1167_v16 = vsel %vm1166_vm10, %v1164_v11, %v1165_v15 }
 0x13e   : > { %1174 = vst [vmem:[%s2275_s10 + $0x30] sm:$0xff] %v1158_v27 }
 0x13f   : > { %1175 = vst [vmem:[%s2275_s10 + $0x38] sm:$0xff] %v1167_v16 }
 0x140   : > { %1795 = shalt.err (!%p1792_p13)
}
 0x141   : > { %1690 = dma.vmem_to_hbm [thread:$0]  (%p1940_p5), %s1376_s28, 1024, %s1378_s15, %s1342_s25   ;;  %1335 = vst [vmem:[%s2416_s9 + $0x38] sm:$0xff] %v1327_v33 }
 0x142   : > { %s1810_s10 = sshra.s32 %s1393_s16, 4  ;;  %s1816_s18 = scalar_lea.hbm %s2562_s6, 128  ;;  %s1811_s10 = int_to_ptr.hbm [resolvable:$true] %s1810_s10 }
 0x143   : > { %s1812_s13 = scalar_lea.hbm %s1811_s10, 64  ;;  %p1817_p3 = scmp.lt.s32.totalorder %s1811_s10, %s2562_s6 }
 0x144   : > { %p1813_p0 = scmp.ne.s32.totalorder %s1811_s10, %s1812_s13  ;;  %p1818_p4 = scmp.lt.s32.totalorder %s1816_s18, %s1812_s13 }
 0x146   : > { %p1814_p1 = pnand %p1813_p0, %p1940_p5  ;;  %p1819_p7 = por %p1818_p4, %p1817_p3 }
 0x148   : > { %p1815_p2 = pneg %p1814_p1 }
 0x14a   : > { %p1820_p8 = pnand %p1819_p7, %p1815_p2 }
 0x14c   : > { %1823 = shalt.err (!%p1820_p8)
}
 0x14d   : > { %1691 = dma.vmem_to_hbm [thread:$0]  (%p1940_p5), %s2508_s14, 1024, %s1393_s16, %s1342_s25  }
 0x14e PF: > { %p1705_p9 = scmp.ge.s32.totalorder %s1862_s24, 2  ;;  %s1404_s9 = sand.u32 1, %s1850_s21  }
 0x14f   : > { %s1405_s28 = scalar_lea.sflag [#allocation3], %s1404_s9 }
 0x150   : > { %p1696_p10 = pnand %p1705_p9, %p1944_p6 }
 0x152   : > { %p1697_p11 = pneg %p1696_p10 }
 0x154   : > { %1841 = dma.done.wait (%p1697_p11), %s1405_s28, 1024  }
 0x155   : > { %1843 = vsyncadd (%p1697_p11), %s1405_s28, 4294966272  ;;  %s1414_s15 = sand.u32 1, %s1527_s26  }
 0x156   : > { %s1415_s7 = scalar_lea.sflag [#allocation5], %s1414_s15 }
 0x157   : > { %1845 = dma.done.wait (%p1697_p11), %s1415_s7, 2048  }
 0x158   : > { %1847 = vsyncadd (%p1697_p11), %s1415_s7, 4294965248  ;;  %p20_p5 = scmp.ge.s32.totalorder %s1925_s27, 4   ;;  %s2573_s21 = smov %s1854_s22 }
 0x159   : > { %s2574_s22 = smov %s1858_s23  ;;  %s2575_s23 = smov %s1938_s30 }
 0x15a   : > { %s2576_s24 = smov %s1925_s27  ;;  %22 = sbr.rel (!%p20_p5) target bundleno = 5 (0x5), region = 106 }
 0x15f   :  { %1431 = vsyncpa [#allocation3], 1 }
 0x160   :  { %1433 = vsyncpa [#allocation3 + $0x1], 1 }
 0x161   :  { %1434 = vsyncpa [#allocation5], 1 }
 0x162   :  { %1436 = vsyncpa [#allocation5 + $0x1], 1 }

</bundles_post_ra>
